<compile_context>
chip_gen: v7x
topology: tpu7x:2x2x1
jax: 0.10.0
libtpu: 0.0.40
codegen_flags: <defaults>
</compile_context>

<pallas_src>
import jax
import jax.numpy as jnp
from jax import lax
from jax.experimental import pallas as pl
from jax.experimental.pallas import tpu as pltpu


def _make_convgru_kernel(H, W, Wp, P, KH, KW, CIN, CH):
    HWp = H * Wp          # length of one tap slice (padded-width flattening)
    C3 = 3 * CH

    def kernel(x_ref, h_ref, wx_ref, wh_ref, bx_ref, bh_ref, out_ref):
        # x_ref: (1, CIN, L) f32   h_ref: (1, CH, L) f32   L = Hp*Wp + KW - 1
        # wx_ref: (KH*KW, 3CH, CIN)  wh_ref: (KH*KW, 3CH, CH)  (compute dtype)
        # bx_ref, bh_ref: (3CH, 1) f32      out_ref: (1, CH, H*Wp)
        xf = x_ref[0]
        hf = h_ref[0]
        cdt = wx_ref.dtype                       # bf16 (default) or f32
        xc = xf.astype(cdt)
        hc = hf.astype(cdt)

        acc_x = jnp.zeros((C3, HWp), jnp.float32)
        acc_h = jnp.zeros((C3, HWp), jnp.float32)
        for k in range(KH * KW):                 # unrolled; 2 MXU pushes/tap
            ki, kj = divmod(k, KW)
            d = ki * Wp + kj                     # flat lane shift of this tap
            acc_x = acc_x + jnp.dot(wx_ref[k], xc[:, d:d + HWp],
                                    preferred_element_type=jnp.float32)
            acc_h = acc_h + jnp.dot(wh_ref[k], hc[:, d:d + HWp],
                                    preferred_element_type=jnp.float32)

        gx = acc_x + bx_ref[...]                 # (3CH, HWp) + (3CH, 1)
        gh = acc_h + bh_ref[...]

        r_t = jax.nn.sigmoid(gx[0:CH] + gh[0:CH])
        z_t = jax.nn.sigmoid(gx[CH:2 * CH] + gh[CH:2 * CH])
        n_t = jnp.tanh(gx[2 * CH:3 * CH] + r_t * gh[2 * CH:3 * CH])

        h_prev = hf[:, P * Wp + P:P * Wp + P + HWp]   # exact f32 interior
        h_new = (1.0 - z_t) * n_t + z_t * h_prev
        out_ref[0] = h_new.astype(out_ref.dtype)

    return kernel


def conv_gru_cell(x_nchw, params, hidden_nchw=None, *,
                  compute_dtype=jnp.bfloat16):
    """Pallas ConvGRUCell forward. x_nchw: (N, Cin, H, W) -> (N, Ch, H, W)."""
    N, CIN, H, W = x_nchw.shape
    w_oihw, _ = params["Wr"]
    CH = w_oihw.shape[0]
    KH, KW = w_oihw.shape[2], w_oihw.shape[3]
    P = KH // 2
    Hp, Wp = H + 2 * P, W + 2 * P
    HWp = H * Wp
    L = Hp * Wp + (KW - 1)      # tail zeros so the last tap slice stays in-bounds

    if hidden_nchw is None:
        hidden_nchw = jnp.zeros((N, CH, H, W), x_nchw.dtype)

    # Tiny fused pad + flatten (no transposes; channel-major layout kept).
    def pad_flat(a):
        ap = jnp.pad(a, ((0, 0), (0, 0), (P, P), (P, P)))
        ap = ap.reshape(N, a.shape[1], Hp * Wp)
        return jnp.pad(ap, ((0, 0), (0, 0), (0, KW - 1))).astype(jnp.float32)

    xf = pad_flat(x_nchw)
    hf = pad_flat(hidden_nchw)

    def fuse_w(names):          # 3x OIHW -> (KH*KW, 3*CH, Cin); gate order r,z,n
        w = jnp.concatenate([params[k][0] for k in names], axis=0)
        w = jnp.transpose(w, (2, 3, 0, 1))              # (KH, KW, 3CH, Cin)
        return w.reshape(KH * KW, 3 * CH, w.shape[-1]).astype(compute_dtype)

    def fuse_b(names):
        return jnp.concatenate([params[k][1] for k in names],
                               axis=0).reshape(3 * CH, 1).astype(jnp.float32)

    wx = fuse_w(("Wr", "Wz", "Wi"))
    wh = fuse_w(("Sr", "Sz", "Si"))
    bx = fuse_b(("Wr", "Wz", "Wi"))
    bh = fuse_b(("Sr", "Sz", "Si"))

    kernel = _make_convgru_kernel(H, W, Wp, P, KH, KW, CIN, CH)

    def full_spec(shape):
        return pl.BlockSpec(shape, lambda n, _nd=len(shape): (0,) * _nd)

    out = pl.pallas_call(
        kernel,
        out_shape=jax.ShapeDtypeStruct((N, CH, HWp), x_nchw.dtype),
        grid_spec=pltpu.PrefetchScalarGridSpec(
            num_scalar_prefetch=0,
            grid=(N,),
            in_specs=[
                pl.BlockSpec((1, CIN, L), lambda n: (n, 0, 0)),
                pl.BlockSpec((1, CH, L), lambda n: (n, 0, 0)),
                full_spec((KH * KW, 3 * CH, CIN)),   # fused input-side weights
                full_spec((KH * KW, 3 * CH, CH)),    # fused hidden-side weights
                full_spec((3 * CH, 1)),              # fused input-side biases
                full_spec((3 * CH, 1)),              # fused hidden-side biases
            ],
            out_specs=pl.BlockSpec((1, CH, HWp), lambda n: (n, 0, 0)),
        ),
        compiler_params=pltpu.CompilerParams(
            dimension_semantics=("parallel",),
            vmem_limit_bytes=32 * 1024 * 1024),
    )(xf, hf, wx, wh, bx, bh)

    # (N, CH, H*Wp) -> (N, CH, H, Wp); drop the Wp-W junk columns -> NCHW.
    return out.reshape(N, CH, H, Wp)[:, :, :, :W]


def conv_gru_ref(x, params, hidden=None):
    """Plain-JAX reference mirroring the PyTorch module (NCHW)."""
    N, CIN, H, W = x.shape
    CH = params["Wr"][0].shape[0]
    if hidden is None:
        hidden = jnp.zeros((N, CH, H, W), x.dtype)

    def conv(inp, w, b):
        p = w.shape[2] // 2
        y = lax.conv_general_dilated(
            inp, w, window_strides=(1, 1), padding=((p, p), (p, p)),
            dimension_numbers=('NCHW', 'OIHW', 'NCHW'))
        return y + b[None, :, None, None]

    r = jax.nn.sigmoid(conv(x, *params["Wr"]) + conv(hidden, *params["Sr"]))
    z = jax.nn.sigmoid(conv(x, *params["Wz"]) + conv(hidden, *params["Sz"]))
    n = jnp.tanh(conv(x, *params["Wi"]) + r * conv(hidden, *params["Si"]))
    return (1.0 - z) * n + z * hidden


def init_params(key, input_channels, hidden_channels, kernel_size):
    """Deterministic synthetic init matching nn.Conv2d parameter shapes."""
    kh, kw = kernel_size
    names_cin = [("Wr", input_channels), ("Wz", input_channels),
                 ("Wi", input_channels), ("Sr", hidden_channels),
                 ("Sz", hidden_channels), ("Si", hidden_channels)]
    params = {}
    for name, cin in names_cin:
        key, kw_key, kb_key = jax.random.split(key, 3)
        w = 0.1 * jax.random.normal(kw_key, (hidden_channels, cin, kh, kw),
                                    jnp.float32)
        b = 0.1 * jax.random.normal(kb_key, (hidden_channels,), jnp.float32)
        params[name] = (w, b)
    return params


if __name__ == "__main__":
    N, CIN, CH, H, W = 2, 4, 8, 16, 16
    KSIZE = (3, 3)

    key = jax.random.PRNGKey(0)
    k_params, k_x, k_h = jax.random.split(key, 3)
    params = init_params(k_params, CIN, CH, KSIZE)
    x = jax.random.normal(k_x, (N, CIN, H, W), jnp.float32)
    hidden = jax.random.normal(k_h, (N, CH, H, W), jnp.float32)

    h_ref = conv_gru_ref(x, params, hidden)

    # Exact path (f32 matmul operands): tight check against the reference.
    h_f32 = jax.block_until_ready(
        conv_gru_cell(x, params, hidden, compute_dtype=jnp.float32))
    assert h_f32.shape == (N, CH, H, W)
    assert jnp.allclose(h_f32, h_ref, atol=1e-4, rtol=1e-4), (
        float(jnp.max(jnp.abs(h_f32 - h_ref))))

    # Default fast path (bf16 matmul operands, f32 accumulate + gate math).
    h_bf16 = jax.block_until_ready(conv_gru_cell(x, params, hidden))
    assert jnp.allclose(h_bf16, h_ref, atol=3e-2, rtol=3e-2), (
        float(jnp.max(jnp.abs(h_bf16 - h_ref))))

    # hidden=None (zero-state) path, like the PyTorch default.
    h0 = jax.block_until_ready(
        conv_gru_cell(x, params, compute_dtype=jnp.float32))
    assert jnp.allclose(h0, conv_gru_ref(x, params), atol=1e-4, rtol=1e-4)

    print("KERNEL_OK")
</pallas_src>

<mosaic_0001>
module attributes {stable_mosaic.version = 11 : i64} {
  func.func @kernel(%arg0: i32, %arg1: memref<1x4x326xf32, #tpu.memory_space<vmem>>, %arg2: memref<1x8x326xf32, #tpu.memory_space<vmem>>, %arg3: memref<9x24x4xf32, #tpu.memory_space<vmem>>, %arg4: memref<9x24x8xf32, #tpu.memory_space<vmem>>, %arg5: memref<24x1xf32, #tpu.memory_space<vmem>>, %arg6: memref<24x1xf32, #tpu.memory_space<vmem>>, %arg7: memref<1x8x288xf32, #tpu.memory_space<vmem>>) attributes {dimension_semantics = [#tpu.dimension_semantics<parallel>], iteration_bounds = array<i64: 2>, scalar_prefetch = 0 : i64, scratch_operands = 0 : i64, tpu.core_type = #tpu.core_type<tc>, window_params = [{transform_indices = @transform_0, window_bounds = array<i64: 1, 4, 326>}, {transform_indices = @transform_1, window_bounds = array<i64: 1, 8, 326>}, {pipeline_mode = #tpu.pipeline_mode<synchronous>, transform_indices = @transform_2, window_bounds = array<i64: 9, 24, 4>}, {pipeline_mode = #tpu.pipeline_mode<synchronous>, transform_indices = @transform_3, window_bounds = array<i64: 9, 24, 8>}, {pipeline_mode = #tpu.pipeline_mode<synchronous>, transform_indices = @transform_4, window_bounds = array<i64: 24, 1>}, {pipeline_mode = #tpu.pipeline_mode<synchronous>, transform_indices = @transform_5, window_bounds = array<i64: 24, 1>}, {transform_indices = @transform_6, window_bounds = array<i64: 1, 8, 288>}]} {
    %c0 = arith.constant 0 : index
    %c0_0 = arith.constant 0 : index
    %c0_1 = arith.constant 0 : index
    %0 = vector.load %arg1[%c0, %c0_0, %c0_1] : memref<1x4x326xf32, #tpu.memory_space<vmem>>, vector<1x4x326xf32>
    %1 = vector.shape_cast %0 : vector<1x4x326xf32> to vector<4x326xf32>
    %c0_2 = arith.constant 0 : index
    %c0_3 = arith.constant 0 : index
    %c0_4 = arith.constant 0 : index
    %2 = vector.load %arg2[%c0_2, %c0_3, %c0_4] : memref<1x8x326xf32, #tpu.memory_space<vmem>>, vector<1x8x326xf32>
    %3 = vector.shape_cast %2 : vector<1x8x326xf32> to vector<8x326xf32>
    %cst = arith.constant 0.000000e+00 : f32
    %4 = vector.broadcast %cst : f32 to vector<24x288xf32>
    %cst_5 = arith.constant 0.000000e+00 : f32
    %5 = vector.broadcast %cst_5 : f32 to vector<24x288xf32>
    %c0_6 = arith.constant 0 : index
    %c0_7 = arith.constant 0 : index
    %c0_8 = arith.constant 0 : index
    %6 = vector.load %arg3[%c0_6, %c0_7, %c0_8] : memref<9x24x4xf32, #tpu.memory_space<vmem>>, vector<1x24x4xf32>
    %7 = vector.shape_cast %6 : vector<1x24x4xf32> to vector<24x4xf32>
    %8 = vector.extract_strided_slice %1 {offsets = [0, 0], sizes = [4, 288], strides = [1, 1]} : vector<4x326xf32> to vector<4x288xf32>
    %cst_9 = arith.constant dense<0.000000e+00> : vector<24x288xf32>
    %9 = tpu.matmul %7, %8, %cst_9 {dimension_numbers = #tpu.dot_dimension_numbers<[1], [0], [0], [1], [0, 0, 1, 1], [], []>} : vector<24x4xf32>, vector<4x288xf32>, vector<24x288xf32> -> vector<24x288xf32>
    %10 = arith.addf %4, %9 : vector<24x288xf32>
    %c0_10 = arith.constant 0 : index
    %c0_11 = arith.constant 0 : index
    %c0_12 = arith.constant 0 : index
    %11 = vector.load %arg4[%c0_10, %c0_11, %c0_12] : memref<9x24x8xf32, #tpu.memory_space<vmem>>, vector<1x24x8xf32>
    %12 = vector.shape_cast %11 : vector<1x24x8xf32> to vector<24x8xf32>
    %13 = vector.extract_strided_slice %3 {offsets = [0, 0], sizes = [8, 288], strides = [1, 1]} : vector<8x326xf32> to vector<8x288xf32>
    %cst_13 = arith.constant dense<0.000000e+00> : vector<24x288xf32>
    %14 = tpu.matmul %12, %13, %cst_13 {dimension_numbers = #tpu.dot_dimension_numbers<[1], [0], [0], [1], [0, 0, 1, 1], [], []>} : vector<24x8xf32>, vector<8x288xf32>, vector<24x288xf32> -> vector<24x288xf32>
    %15 = arith.addf %5, %14 : vector<24x288xf32>
    %c1 = arith.constant 1 : index
    %c0_14 = arith.constant 0 : index
    %c0_15 = arith.constant 0 : index
    %16 = vector.load %arg3[%c1, %c0_14, %c0_15] : memref<9x24x4xf32, #tpu.memory_space<vmem>>, vector<1x24x4xf32>
    %17 = vector.shape_cast %16 : vector<1x24x4xf32> to vector<24x4xf32>
    %18 = vector.extract_strided_slice %1 {offsets = [0, 1], sizes = [4, 288], strides = [1, 1]} : vector<4x326xf32> to vector<4x288xf32>
    %cst_16 = arith.constant dense<0.000000e+00> : vector<24x288xf32>
    %19 = tpu.matmul %17, %18, %cst_16 {dimension_numbers = #tpu.dot_dimension_numbers<[1], [0], [0], [1], [0, 0, 1, 1], [], []>} : vector<24x4xf32>, vector<4x288xf32>, vector<24x288xf32> -> vector<24x288xf32>
    %20 = arith.addf %10, %19 : vector<24x288xf32>
    %c1_17 = arith.constant 1 : index
    %c0_18 = arith.constant 0 : index
    %c0_19 = arith.constant 0 : index
    %21 = vector.load %arg4[%c1_17, %c0_18, %c0_19] : memref<9x24x8xf32, #tpu.memory_space<vmem>>, vector<1x24x8xf32>
    %22 = vector.shape_cast %21 : vector<1x24x8xf32> to vector<24x8xf32>
    %23 = vector.extract_strided_slice %3 {offsets = [0, 1], sizes = [8, 288], strides = [1, 1]} : vector<8x326xf32> to vector<8x288xf32>
    %cst_20 = arith.constant dense<0.000000e+00> : vector<24x288xf32>
    %24 = tpu.matmul %22, %23, %cst_20 {dimension_numbers = #tpu.dot_dimension_numbers<[1], [0], [0], [1], [0, 0, 1, 1], [], []>} : vector<24x8xf32>, vector<8x288xf32>, vector<24x288xf32> -> vector<24x288xf32>
    %25 = arith.addf %15, %24 : vector<24x288xf32>
    %c2 = arith.constant 2 : index
    %c0_21 = arith.constant 0 : index
    %c0_22 = arith.constant 0 : index
    %26 = vector.load %arg3[%c2, %c0_21, %c0_22] : memref<9x24x4xf32, #tpu.memory_space<vmem>>, vector<1x24x4xf32>
    %27 = vector.shape_cast %26 : vector<1x24x4xf32> to vector<24x4xf32>
    %28 = vector.extract_strided_slice %1 {offsets = [0, 2], sizes = [4, 288], strides = [1, 1]} : vector<4x326xf32> to vector<4x288xf32>
    %cst_23 = arith.constant dense<0.000000e+00> : vector<24x288xf32>
    %29 = tpu.matmul %27, %28, %cst_23 {dimension_numbers = #tpu.dot_dimension_numbers<[1], [0], [0], [1], [0, 0, 1, 1], [], []>} : vector<24x4xf32>, vector<4x288xf32>, vector<24x288xf32> -> vector<24x288xf32>
    %30 = arith.addf %20, %29 : vector<24x288xf32>
    %c2_24 = arith.constant 2 : index
    %c0_25 = arith.constant 0 : index
    %c0_26 = arith.constant 0 : index
    %31 = vector.load %arg4[%c2_24, %c0_25, %c0_26] : memref<9x24x8xf32, #tpu.memory_space<vmem>>, vector<1x24x8xf32>
    %32 = vector.shape_cast %31 : vector<1x24x8xf32> to vector<24x8xf32>
    %33 = vector.extract_strided_slice %3 {offsets = [0, 2], sizes = [8, 288], strides = [1, 1]} : vector<8x326xf32> to vector<8x288xf32>
    %cst_27 = arith.constant dense<0.000000e+00> : vector<24x288xf32>
    %34 = tpu.matmul %32, %33, %cst_27 {dimension_numbers = #tpu.dot_dimension_numbers<[1], [0], [0], [1], [0, 0, 1, 1], [], []>} : vector<24x8xf32>, vector<8x288xf32>, vector<24x288xf32> -> vector<24x288xf32>
    %35 = arith.addf %25, %34 : vector<24x288xf32>
    %c3 = arith.constant 3 : index
    %c0_28 = arith.constant 0 : index
    %c0_29 = arith.constant 0 : index
    %36 = vector.load %arg3[%c3, %c0_28, %c0_29] : memref<9x24x4xf32, #tpu.memory_space<vmem>>, vector<1x24x4xf32>
    %37 = vector.shape_cast %36 : vector<1x24x4xf32> to vector<24x4xf32>
    %38 = vector.extract_strided_slice %1 {offsets = [0, 18], sizes = [4, 288], strides = [1, 1]} : vector<4x326xf32> to vector<4x288xf32>
    %cst_30 = arith.constant dense<0.000000e+00> : vector<24x288xf32>
    %39 = tpu.matmul %37, %38, %cst_30 {dimension_numbers = #tpu.dot_dimension_numbers<[1], [0], [0], [1], [0, 0, 1, 1], [], []>} : vector<24x4xf32>, vector<4x288xf32>, vector<24x288xf32> -> vector<24x288xf32>
    %40 = arith.addf %30, %39 : vector<24x288xf32>
    %c3_31 = arith.constant 3 : index
    %c0_32 = arith.constant 0 : index
    %c0_33 = arith.constant 0 : index
    %41 = vector.load %arg4[%c3_31, %c0_32, %c0_33] : memref<9x24x8xf32, #tpu.memory_space<vmem>>, vector<1x24x8xf32>
    %42 = vector.shape_cast %41 : vector<1x24x8xf32> to vector<24x8xf32>
    %43 = vector.extract_strided_slice %3 {offsets = [0, 18], sizes = [8, 288], strides = [1, 1]} : vector<8x326xf32> to vector<8x288xf32>
    %cst_34 = arith.constant dense<0.000000e+00> : vector<24x288xf32>
    %44 = tpu.matmul %42, %43, %cst_34 {dimension_numbers = #tpu.dot_dimension_numbers<[1], [0], [0], [1], [0, 0, 1, 1], [], []>} : vector<24x8xf32>, vector<8x288xf32>, vector<24x288xf32> -> vector<24x288xf32>
    %45 = arith.addf %35, %44 : vector<24x288xf32>
    %c4 = arith.constant 4 : index
    %c0_35 = arith.constant 0 : index
    %c0_36 = arith.constant 0 : index
    %46 = vector.load %arg3[%c4, %c0_35, %c0_36] : memref<9x24x4xf32, #tpu.memory_space<vmem>>, vector<1x24x4xf32>
    %47 = vector.shape_cast %46 : vector<1x24x4xf32> to vector<24x4xf32>
    %48 = vector.extract_strided_slice %1 {offsets = [0, 19], sizes = [4, 288], strides = [1, 1]} : vector<4x326xf32> to vector<4x288xf32>
    %cst_37 = arith.constant dense<0.000000e+00> : vector<24x288xf32>
    %49 = tpu.matmul %47, %48, %cst_37 {dimension_numbers = #tpu.dot_dimension_numbers<[1], [0], [0], [1], [0, 0, 1, 1], [], []>} : vector<24x4xf32>, vector<4x288xf32>, vector<24x288xf32> -> vector<24x288xf32>
    %50 = arith.addf %40, %49 : vector<24x288xf32>
    %c4_38 = arith.constant 4 : index
    %c0_39 = arith.constant 0 : index
    %c0_40 = arith.constant 0 : index
    %51 = vector.load %arg4[%c4_38, %c0_39, %c0_40] : memref<9x24x8xf32, #tpu.memory_space<vmem>>, vector<1x24x8xf32>
    %52 = vector.shape_cast %51 : vector<1x24x8xf32> to vector<24x8xf32>
    %53 = vector.extract_strided_slice %3 {offsets = [0, 19], sizes = [8, 288], strides = [1, 1]} : vector<8x326xf32> to vector<8x288xf32>
    %cst_41 = arith.constant dense<0.000000e+00> : vector<24x288xf32>
    %54 = tpu.matmul %52, %53, %cst_41 {dimension_numbers = #tpu.dot_dimension_numbers<[1], [0], [0], [1], [0, 0, 1, 1], [], []>} : vector<24x8xf32>, vector<8x288xf32>, vector<24x288xf32> -> vector<24x288xf32>
    %55 = arith.addf %45, %54 : vector<24x288xf32>
    %c5 = arith.constant 5 : index
    %c0_42 = arith.constant 0 : index
    %c0_43 = arith.constant 0 : index
    %56 = vector.load %arg3[%c5, %c0_42, %c0_43] : memref<9x24x4xf32, #tpu.memory_space<vmem>>, vector<1x24x4xf32>
    %57 = vector.shape_cast %56 : vector<1x24x4xf32> to vector<24x4xf32>
    %58 = vector.extract_strided_slice %1 {offsets = [0, 20], sizes = [4, 288], strides = [1, 1]} : vector<4x326xf32> to vector<4x288xf32>
    %cst_44 = arith.constant dense<0.000000e+00> : vector<24x288xf32>
    %59 = tpu.matmul %57, %58, %cst_44 {dimension_numbers = #tpu.dot_dimension_numbers<[1], [0], [0], [1], [0, 0, 1, 1], [], []>} : vector<24x4xf32>, vector<4x288xf32>, vector<24x288xf32> -> vector<24x288xf32>
    %60 = arith.addf %50, %59 : vector<24x288xf32>
    %c5_45 = arith.constant 5 : index
    %c0_46 = arith.constant 0 : index
    %c0_47 = arith.constant 0 : index
    %61 = vector.load %arg4[%c5_45, %c0_46, %c0_47] : memref<9x24x8xf32, #tpu.memory_space<vmem>>, vector<1x24x8xf32>
    %62 = vector.shape_cast %61 : vector<1x24x8xf32> to vector<24x8xf32>
    %63 = vector.extract_strided_slice %3 {offsets = [0, 20], sizes = [8, 288], strides = [1, 1]} : vector<8x326xf32> to vector<8x288xf32>
    %cst_48 = arith.constant dense<0.000000e+00> : vector<24x288xf32>
    %64 = tpu.matmul %62, %63, %cst_48 {dimension_numbers = #tpu.dot_dimension_numbers<[1], [0], [0], [1], [0, 0, 1, 1], [], []>} : vector<24x8xf32>, vector<8x288xf32>, vector<24x288xf32> -> vector<24x288xf32>
    %65 = arith.addf %55, %64 : vector<24x288xf32>
    %c6 = arith.constant 6 : index
    %c0_49 = arith.constant 0 : index
    %c0_50 = arith.constant 0 : index
    %66 = vector.load %arg3[%c6, %c0_49, %c0_50] : memref<9x24x4xf32, #tpu.memory_space<vmem>>, vector<1x24x4xf32>
    %67 = vector.shape_cast %66 : vector<1x24x4xf32> to vector<24x4xf32>
    %68 = vector.extract_strided_slice %1 {offsets = [0, 36], sizes = [4, 288], strides = [1, 1]} : vector<4x326xf32> to vector<4x288xf32>
    %cst_51 = arith.constant dense<0.000000e+00> : vector<24x288xf32>
    %69 = tpu.matmul %67, %68, %cst_51 {dimension_numbers = #tpu.dot_dimension_numbers<[1], [0], [0], [1], [0, 0, 1, 1], [], []>} : vector<24x4xf32>, vector<4x288xf32>, vector<24x288xf32> -> vector<24x288xf32>
    %70 = arith.addf %60, %69 : vector<24x288xf32>
    %c6_52 = arith.constant 6 : index
    %c0_53 = arith.constant 0 : index
    %c0_54 = arith.constant 0 : index
    %71 = vector.load %arg4[%c6_52, %c0_53, %c0_54] : memref<9x24x8xf32, #tpu.memory_space<vmem>>, vector<1x24x8xf32>
    %72 = vector.shape_cast %71 : vector<1x24x8xf32> to vector<24x8xf32>
    %73 = vector.extract_strided_slice %3 {offsets = [0, 36], sizes = [8, 288], strides = [1, 1]} : vector<8x326xf32> to vector<8x288xf32>
    %cst_55 = arith.constant dense<0.000000e+00> : vector<24x288xf32>
    %74 = tpu.matmul %72, %73, %cst_55 {dimension_numbers = #tpu.dot_dimension_numbers<[1], [0], [0], [1], [0, 0, 1, 1], [], []>} : vector<24x8xf32>, vector<8x288xf32>, vector<24x288xf32> -> vector<24x288xf32>
    %75 = arith.addf %65, %74 : vector<24x288xf32>
    %c7 = arith.constant 7 : index
    %c0_56 = arith.constant 0 : index
    %c0_57 = arith.constant 0 : index
    %76 = vector.load %arg3[%c7, %c0_56, %c0_57] : memref<9x24x4xf32, #tpu.memory_space<vmem>>, vector<1x24x4xf32>
    %77 = vector.shape_cast %76 : vector<1x24x4xf32> to vector<24x4xf32>
    %78 = vector.extract_strided_slice %1 {offsets = [0, 37], sizes = [4, 288], strides = [1, 1]} : vector<4x326xf32> to vector<4x288xf32>
    %cst_58 = arith.constant dense<0.000000e+00> : vector<24x288xf32>
    %79 = tpu.matmul %77, %78, %cst_58 {dimension_numbers = #tpu.dot_dimension_numbers<[1], [0], [0], [1], [0, 0, 1, 1], [], []>} : vector<24x4xf32>, vector<4x288xf32>, vector<24x288xf32> -> vector<24x288xf32>
    %80 = arith.addf %70, %79 : vector<24x288xf32>
    %c7_59 = arith.constant 7 : index
    %c0_60 = arith.constant 0 : index
    %c0_61 = arith.constant 0 : index
    %81 = vector.load %arg4[%c7_59, %c0_60, %c0_61] : memref<9x24x8xf32, #tpu.memory_space<vmem>>, vector<1x24x8xf32>
    %82 = vector.shape_cast %81 : vector<1x24x8xf32> to vector<24x8xf32>
    %83 = vector.extract_strided_slice %3 {offsets = [0, 37], sizes = [8, 288], strides = [1, 1]} : vector<8x326xf32> to vector<8x288xf32>
    %cst_62 = arith.constant dense<0.000000e+00> : vector<24x288xf32>
    %84 = tpu.matmul %82, %83, %cst_62 {dimension_numbers = #tpu.dot_dimension_numbers<[1], [0], [0], [1], [0, 0, 1, 1], [], []>} : vector<24x8xf32>, vector<8x288xf32>, vector<24x288xf32> -> vector<24x288xf32>
    %85 = arith.addf %75, %84 : vector<24x288xf32>
    %c8 = arith.constant 8 : index
    %c0_63 = arith.constant 0 : index
    %c0_64 = arith.constant 0 : index
    %86 = vector.load %arg3[%c8, %c0_63, %c0_64] : memref<9x24x4xf32, #tpu.memory_space<vmem>>, vector<1x24x4xf32>
    %87 = vector.shape_cast %86 : vector<1x24x4xf32> to vector<24x4xf32>
    %88 = vector.extract_strided_slice %1 {offsets = [0, 38], sizes = [4, 288], strides = [1, 1]} : vector<4x326xf32> to vector<4x288xf32>
    %cst_65 = arith.constant dense<0.000000e+00> : vector<24x288xf32>
    %89 = tpu.matmul %87, %88, %cst_65 {dimension_numbers = #tpu.dot_dimension_numbers<[1], [0], [0], [1], [0, 0, 1, 1], [], []>} : vector<24x4xf32>, vector<4x288xf32>, vector<24x288xf32> -> vector<24x288xf32>
    %90 = arith.addf %80, %89 : vector<24x288xf32>
    %c8_66 = arith.constant 8 : index
    %c0_67 = arith.constant 0 : index
    %c0_68 = arith.constant 0 : index
    %91 = vector.load %arg4[%c8_66, %c0_67, %c0_68] : memref<9x24x8xf32, #tpu.memory_space<vmem>>, vector<1x24x8xf32>
    %92 = vector.shape_cast %91 : vector<1x24x8xf32> to vector<24x8xf32>
    %93 = vector.extract_strided_slice %3 {offsets = [0, 38], sizes = [8, 288], strides = [1, 1]} : vector<8x326xf32> to vector<8x288xf32>
    %cst_69 = arith.constant dense<0.000000e+00> : vector<24x288xf32>
    %94 = tpu.matmul %92, %93, %cst_69 {dimension_numbers = #tpu.dot_dimension_numbers<[1], [0], [0], [1], [0, 0, 1, 1], [], []>} : vector<24x8xf32>, vector<8x288xf32>, vector<24x288xf32> -> vector<24x288xf32>
    %95 = arith.addf %85, %94 : vector<24x288xf32>
    %c0_70 = arith.constant 0 : index
    %c0_71 = arith.constant 0 : index
    %96 = vector.load %arg5[%c0_70, %c0_71] : memref<24x1xf32, #tpu.memory_space<vmem>>, vector<24x1xf32>
    %97 = vector.broadcast %96 : vector<24x1xf32> to vector<24x288xf32>
    %98 = arith.addf %90, %97 : vector<24x288xf32>
    %c0_72 = arith.constant 0 : index
    %c0_73 = arith.constant 0 : index
    %99 = vector.load %arg6[%c0_72, %c0_73] : memref<24x1xf32, #tpu.memory_space<vmem>>, vector<24x1xf32>
    %100 = vector.broadcast %99 : vector<24x1xf32> to vector<24x288xf32>
    %101 = arith.addf %95, %100 : vector<24x288xf32>
    %102 = vector.extract_strided_slice %98 {offsets = [0, 0], sizes = [8, 288], strides = [1, 1]} : vector<24x288xf32> to vector<8x288xf32>
    %103 = vector.extract_strided_slice %101 {offsets = [0, 0], sizes = [8, 288], strides = [1, 1]} : vector<24x288xf32> to vector<8x288xf32>
    %104 = arith.addf %102, %103 : vector<8x288xf32>
    %105 = arith.negf %104 : vector<8x288xf32>
    %106 = math.exp %105 : vector<8x288xf32>
    %cst_74 = arith.constant 1.000000e+00 : f32
    %107 = vector.broadcast %cst_74 : f32 to vector<8x288xf32>
    %108 = arith.addf %107, %106 : vector<8x288xf32>
    %109 = arith.divf %107, %108 : vector<8x288xf32>
    %110 = vector.extract_strided_slice %98 {offsets = [8, 0], sizes = [8, 288], strides = [1, 1]} : vector<24x288xf32> to vector<8x288xf32>
    %111 = vector.extract_strided_slice %101 {offsets = [8, 0], sizes = [8, 288], strides = [1, 1]} : vector<24x288xf32> to vector<8x288xf32>
    %112 = arith.addf %110, %111 : vector<8x288xf32>
    %113 = arith.negf %112 : vector<8x288xf32>
    %114 = math.exp %113 : vector<8x288xf32>
    %cst_75 = arith.constant 1.000000e+00 : f32
    %115 = vector.broadcast %cst_75 : f32 to vector<8x288xf32>
    %116 = arith.addf %115, %114 : vector<8x288xf32>
    %117 = arith.divf %115, %116 : vector<8x288xf32>
    %118 = vector.extract_strided_slice %98 {offsets = [16, 0], sizes = [8, 288], strides = [1, 1]} : vector<24x288xf32> to vector<8x288xf32>
    %119 = vector.extract_strided_slice %101 {offsets = [16, 0], sizes = [8, 288], strides = [1, 1]} : vector<24x288xf32> to vector<8x288xf32>
    %120 = arith.mulf %109, %119 : vector<8x288xf32>
    %121 = arith.addf %118, %120 : vector<8x288xf32>
    %122 = math.tanh %121 : vector<8x288xf32>
    %123 = vector.extract_strided_slice %3 {offsets = [0, 19], sizes = [8, 288], strides = [1, 1]} : vector<8x326xf32> to vector<8x288xf32>
    %cst_76 = arith.constant 1.000000e+00 : f32
    %124 = vector.broadcast %cst_76 : f32 to vector<8x288xf32>
    %125 = arith.subf %124, %117 : vector<8x288xf32>
    %126 = arith.mulf %125, %122 : vector<8x288xf32>
    %127 = arith.mulf %117, %123 : vector<8x288xf32>
    %128 = arith.addf %126, %127 : vector<8x288xf32>
    %c0_77 = arith.constant 0 : index
    %c0_78 = arith.constant 0 : index
    %c0_79 = arith.constant 0 : index
    %129 = vector.load %arg7[%c0_77, %c0_78, %c0_79] : memref<1x8x288xf32, #tpu.memory_space<vmem>>, vector<1x8x288xf32>
    %130 = vector.shape_cast %129 : vector<1x8x288xf32> to vector<8x288xf32>
    %131 = vector.shape_cast %128 : vector<8x288xf32> to vector<1x8x288xf32>
    tpu.vector_store %arg7[%c0_77, %c0_78, %c0_79], %131 {strides = array<i32>} : memref<1x8x288xf32, #tpu.memory_space<vmem>>, vector<1x8x288xf32>,
    return
  }
  func.func @transform_0(%arg0: i32) -> (i32, i32, i32) {
    %c0_i32 = arith.constant 0 : i32
    %c0_i32_0 = arith.constant 0 : i32
    %c0_i32_1 = arith.constant 0 : i32
    return %arg0, %c0_i32, %c0_i32_0 : i32, i32, i32
  }
  func.func @transform_1(%arg0: i32) -> (i32, i32, i32) {
    %c0_i32 = arith.constant 0 : i32
    %c0_i32_0 = arith.constant 0 : i32
    %c0_i32_1 = arith.constant 0 : i32
    return %arg0, %c0_i32, %c0_i32_0 : i32, i32, i32
  }
  func.func @transform_2(%arg0: i32) -> (i32, i32, i32) {
    %c0_i32 = arith.constant 0 : i32
    %c0_i32_0 = arith.constant 0 : i32
    %c0_i32_1 = arith.constant 0 : i32
    %c0_i32_2 = arith.constant 0 : i32
    return %c0_i32, %c0_i32_0, %c0_i32_1 : i32, i32, i32
  }
  func.func @transform_3(%arg0: i32) -> (i32, i32, i32) {
    %c0_i32 = arith.constant 0 : i32
    %c0_i32_0 = arith.constant 0 : i32
    %c0_i32_1 = arith.constant 0 : i32
    %c0_i32_2 = arith.constant 0 : i32
    return %c0_i32, %c0_i32_0, %c0_i32_1 : i32, i32, i32
  }
  func.func @transform_4(%arg0: i32) -> (i32, i32) {
    %c0_i32 = arith.constant 0 : i32
    %c0_i32_0 = arith.constant 0 : i32
    %c0_i32_1 = arith.constant 0 : i32
    return %c0_i32, %c0_i32_0 : i32, i32
  }
  func.func @transform_5(%arg0: i32) -> (i32, i32) {
    %c0_i32 = arith.constant 0 : i32
    %c0_i32_0 = arith.constant 0 : i32
    %c0_i32_1 = arith.constant 0 : i32
    return %c0_i32, %c0_i32_0 : i32, i32
  }
  func.func @transform_6(%arg0: i32) -> (i32, i32, i32) {
    %c0_i32 = arith.constant 0 : i32
    %c0_i32_0 = arith.constant 0 : i32
    %c0_i32_1 = arith.constant 0 : i32
    return %arg0, %c0_i32, %c0_i32_0 : i32, i32, i32
  }
}

</mosaic_0001>

<bundles_post_ra>
// kernel: tpu_custom_call.1
= control target key start
LH: loop header
LB: loop body
LE: loop exit
PB: predicated region body
PF: predicated region fallthrough
CT: control target
= control target key end

     0   :  { %11 = vsyncpa [#allocation3], 0  ;;  %s5563_s0 = inlined_call_operand.vmem [shape: f32[2,4,326], index: 0, kind: input, shape index: {}]   ;;  %s5564_s1 = inlined_call_operand.vmem [shape: f32[2,8,326], index: 1, kind: input, shape index: {}]   ;;  %s5565_s2 = inlined_call_operand.vmem [shape: f32[9,24,4], index: 2, kind: input, shape index: {}]   ;;  %s5566_s3 = inlined_call_operand.vmem [shape: f32[9,24,8], index: 3, kind: input, shape index: {}]   ;;  %s5567_s4 = inlined_call_operand.vmem [shape: f32[24,1], index: 4, kind: input, shape index: {}]   ;;  %s5568_s5 = inlined_call_operand.vmem [shape: f32[24,1], index: 5, kind: input, shape index: {}]   ;;  %s5569_s6 = inlined_call_operand.hbm [shape: f32[2,8,288], index: 6, kind: output, shape index: {}]  }
   0x1   :  { %13 = vsyncpa [#allocation3 + $0x1], 0  ;;  %s4843_s21 = smov 0   ;;  %s4845_s22 = smov 0  }
   0x2   :  { %s4847_s23 = smov 0   ;;  %s4849_s24 = smov 0  }
   0x3 LB: > { %s4864_s25 = sadd.s32 4294967295, %s4794_s24   ;;  %s3997_s26 = sadd.s32 4294967294, %s4794_s24   ;;  %s4794_s24 = sphi %s4849_s24, %s5575_s24   ;;  %s4790_s23 = sphi %s4847_s23, %s5574_s23   ;;  %s4786_s22 = sphi %s4845_s22, %s5573_s22   ;;  %s4782_s21 = sphi %s4843_s21, %s5572_s21  }
   0x4   : > { %s4868_s27 = sadd.s32 1, %s4794_s24   ;;  %s162_s28 = sadd.s32 1, %s4790_s23 }
   0x5   : > { %s159_s29 = ssub.s32 %s4794_s24, %s4868_s27  ;;  %p172_p0 = scmp.ne.s32.totalorder %s4790_s23, %s4786_s22 }
   0x6   : > { %p160_p1 = scmp.eq.s32.totalorder %s159_s29, 0  ;;  %p173_p2 = scmp.eq.s32.totalorder %s4864_s25, 1 }
   0x7   : > { %p178_p3 = scmp.ne.s32.totalorder %s4786_s22, %s4782_s21  ;;  %p179_p4 = scmp.eq.s32.totalorder %s3997_s26, 1 }
   0x8   : > { %s4879_s30 = scalar_select %p160_p1, %s4790_s23, %s162_s28  }
   0x9   : > { %p4881_p5 = por %p173_p2, %p172_p0  ;;  %p4885_p6 = por %p179_p4, %p178_p3 }
   0xa   : > { %p4000_p7 = scmp.ge.s32.totalorder %s4794_s24, 1  ;;  %p225_p8 = scmp.lt.s32.totalorder %s4794_s24, 3 }
   0xc   : > { %p226_p9 = pnand %p4000_p7, %p225_p8 }
   0xd   : > { %p260_p10 = scmp.lt.s32.totalorder (!%p226_p9), %s4864_s25, 1  ;;  %v4796_v0 = vmov (!%p226_p9), 0.0   ;;  %vm4797_vm0 = vmmov (!%p226_p9), 0   ;;  %s4798_s18 = smov (!%p226_p9), 127   ;;  %vm307_vm1 = vcmask (!%p226_p9), 1043456   ;;  %vm294_vm2 = vcmask (!%p226_p9), 1039360  }
   0xe   : > { %229 = sbr.rel (%p226_p9) target bundleno = 631 (0x277), region = 44  ;;  %4267 = vmatprep.subr.mxu1 (!%p226_p9), %v4796_v0  ;;  %4269 = vmatprep.mubr.msk.f32.mxu1 (!%p226_p9), %vm4797_vm0, %v4796_v0  ;;  %s4799_s19 = smov (!%p226_p9), 126   ;;  %v4003_v9 = vld [vmem:[%s5565_s2 + $0x18] sm:$0xff] (!%p226_p9)  ;;  %vm297_vm3 = vcmask (!%p226_p9), 31744   ;;  %v4004_v13 = vld [vmem:[%s5565_s2 + $0x20] sm:$0xff] (!%p226_p9)  ;;  %v4005_v17 = vld [vmem:[%s5565_s2 + $0x28] sm:$0xff] (!%p226_p9) }
   0xf   : > { %378 = vmatprep.mubr.f32.mxu0 (!%p226_p9), %v4796_v0  ;;  %s4800_s20 = smov (!%p226_p9), 110   ;;  %s4801_s26 = smov (!%p226_p9), 109   ;;  %v275_v19 = vld [vmem:[%s5565_s2] sm:$0xff] (!%p226_p9)  ;;  %v276_v21 = vld [vmem:[%s5565_s2 + $0x8] sm:$0xff] (!%p226_p9)  ;;  %v277_v22 = vld [vmem:[%s5565_s2 + $0x10] sm:$0xff] (!%p226_p9)  ;;  %vm673_vm4 = vcmask (!%p226_p9), 64512  }
  0x10   : > { %s4802_s28 = smov (!%p226_p9), 108   ;;  %s4803_s29 = smov (!%p226_p9), 92   ;;  %v4024_v23 = vld [vmem:[%s5566_s3 + $0x18] sm:$0xff] (!%p226_p9)  ;;  %vm1028_vm5 = vcmask (!%p226_p9), 1031168   ;;  %v4025_v26 = vld [vmem:[%s5566_s3 + $0x20] sm:$0xff] (!%p226_p9)  ;;  %v4026_v28 = vld [vmem:[%s5566_s3 + $0x28] sm:$0xff] (!%p226_p9) }
  0x11   : > { %v278_v30 = vld [vmem:[%s5566_s3] sm:$0xff] (!%p226_p9)  ;;  %v279_v34 = vld [vmem:[%s5566_s3 + $0x8] sm:$0xff] (!%p226_p9)  ;;  %v280_v36 = vld [vmem:[%s5566_s3 + $0x10] sm:$0xff] (!%p226_p9)  ;;  %vm1424_vm6 = vcmask (!%p226_p9), 900096   ;;  %vm1820_vm7 = vcmask (!%p226_p9), 891904   ;;  %vm2216_vm8 = vcmask (!%p226_p9), 883712  }
  0x12   : > { %v4039_v38 = vld [vmem:[%s5565_s2 + $0x30] sm:$0xff] (!%p226_p9)  ;;  %v4040_v42 = vld [vmem:[%s5565_s2 + $0x38] sm:$0xff] (!%p226_p9)  ;;  %v4041_v44 = vld [vmem:[%s5565_s2 + $0x40] sm:$0xff] (!%p226_p9)  ;;  %vm2612_vm9 = vcmask (!%p226_p9), 752640   ;;  %vm3008_vm10 = vcmask (!%p226_p9), 744448   ;;  %vm3404_vm11 = vcmask (!%p226_p9), 736256  }
  0x13   : > { %v4051_v46 = vld [vmem:[%s5566_s3 + $0x30] sm:$0xff] (!%p226_p9)  ;;  %v4052_v50 = vld [vmem:[%s5566_s3 + $0x38] sm:$0xff] (!%p226_p9)  ;;  %v4053_v52 = vld [vmem:[%s5566_s3 + $0x40] sm:$0xff] (!%p226_p9)  ;;  %vm3909_vm12 = vcmask (!%p226_p9), 261120   ;;  %s4648_s13 = smul.u32 (!%p226_p9), 384, %s4864_s25 }
  0x14   : > { %v4060_v54 = vld [vmem:[%s5565_s2 + $0x48] sm:$0xff] (!%p226_p9)  ;;  %v4061_v58 = vld [vmem:[%s5565_s2 + $0x50] sm:$0xff] (!%p226_p9)  ;;  %v4062_v60 = vld [vmem:[%s5565_s2 + $0x58] sm:$0xff] (!%p226_p9) }
  0x15   : > { %s261_s9 = scalar_select %p260_p10, %s4864_s25, 1  ;;  %v4072_v62 = vld [vmem:[%s5566_s3 + $0x48] sm:$0xff] }
  0x17   : > { %s4646_s10 = smul.u32 12, %s261_s9 }
  0x18   : > { %s4647_s11 = smul.u32 24, %s261_s9  ;;  %s4804_s9 = smov 91  }
  0x19   : > { %s264_s14 = scalar_lea.vmem %s5563_s0, %s4646_s10  ;;  %s4805_s10 = smov 90  }
  0x1a   : > { %v4900_v1 = vld [vmem:[%s264_s14] sm:$0xff]  ;;  %s269_s17 = scalar_lea.vmem %s5564_s1, %s4647_s11  ;;  %v4913_v4 = vld [vmem:[%s264_s14 + $0x8] sm:$0xf]  ;;  %s257_s11 = sand.u32 1, %s4786_s22  }
  0x1b   : > { %288 = vrot.lane.b32.xlu1 %v4900_v1, %s4798_s18  ;;  %v4908_v2 = vcombine.high %v4900_v1, %v4900_v1  ;;  %v4910_v3 = vld [vmem:[%s269_s17 + $0x8] sm:$0xff]  ;;  %v4916_v5 = vld [vmem:[%s269_s17] sm:$0xff]  ;;  %v4919_v6 = vld [vmem:[%s269_s17 + $0x10] sm:$0xff]  ;;  %s4645_s12 = smul.u32 24, %s257_s11  ;;  %s3912_s25 = scalar_lea.sflag [#allocation3], %s257_s11 }
  0x1d   : > { %290 = vrot.lane.b32.xlu0 %v4908_v2, %s4798_s18  ;;  %s259_s14 = scalar_lea.vmem [#allocation2], %s4645_s12 }
  0x1e   : > { %s3926_s15 = sshll.u32 %s259_s14, 4  ;;  %s5523_s15 = int_to_ptr.vmem [resolvable:$true] %s3926_s15 }
  0x1f   : > { %664 = vrot.lane.b32.xlu1 %v4910_v3, %s4798_s18 }
  0x21   : > { %292 = vrot.lane.b32.xlu0 %v4913_v4, %s4798_s18 }
  0x23   : > { %662 = vrot.lane.b32.xlu1 %v4916_v5, %s4798_s18 }
  0x25   : > { %666 = vrot.lane.b32.xlu0 %v4919_v6, %s4798_s18  ;;  %s5521_s18 = scalar_lea.hbm %s5569_s6, %s4648_s13 }
  0x27   : > { %1026 = vrot.lane.b32.xlu1 %v4913_v4, %s4799_s19 }
  0x29   : > { %1024 = vrot.lane.b32.xlu0 %v4908_v2, %s4799_s19 }
  0x2b   : > { %1224 = vrot.lane.b32.xlu1 %v4910_v3, %s4799_s19 }
  0x2d   : > { %1022 = vrot.lane.b32.xlu0 %v4900_v1, %s4799_s19 }
  0x2f   : > { %1222 = vrot.lane.b32.xlu1 %v4916_v5, %s4799_s19 }
  0x31   : > { %1226 = vrot.lane.b32.xlu0 %v4919_v6, %s4799_s19  ;;  %s4732_s19 = scalar_lea.vmem %s5523_s15, 384 }
  0x32   : > { %p4733_p11 = scmp.ne.s32.totalorder %s5523_s15, %s4732_s19 }
  0x33   : > { %1422 = vrot.lane.b32.xlu1 %v4913_v4, %s4800_s20 }
  0x34   : > { %p4734_p12 = pnand %p4733_p11, %p4881_p5 }
  0x35   : > { %1420 = vrot.lane.b32.xlu0 %v4908_v2, %s4800_s20 }
  0x36   : > { %p4735_p13 = pneg %p4734_p12 }
  0x37   : > { %1620 = vrot.lane.b32.xlu1 %v4910_v3, %s4800_s20 }
  0x39   : > { %1418 = vrot.lane.b32.xlu0 %v4900_v1, %s4800_s20 }
  0x3b   : > { %1618 = vrot.lane.b32.xlu1 %v4916_v5, %s4800_s20 }
  0x3d   : > { %1622 = vrot.lane.b32.xlu0 %v4919_v6, %s4800_s20  ;;  %s4807_s20 = smov [#allocation2]  }
  0x3f   : > { %1818 = vrot.lane.b32.xlu1 %v4913_v4, %s4801_s26 }
  0x41   : > { %1816 = vrot.lane.b32.xlu0 %v4908_v2, %s4801_s26 }
  0x43   : > { %2016 = vrot.lane.b32.xlu1 %v4910_v3, %s4801_s26 }
  0x45   : > { %1814 = vrot.lane.b32.xlu0 %v4900_v1, %s4801_s26 }
  0x47   : > { %2014 = vrot.lane.b32.xlu1 %v4916_v5, %s4801_s26 }
  0x49   : > { %2018 = vrot.lane.b32.xlu0 %v4919_v6, %s4801_s26  ;;  %s4736_s26 = sshll.u32 %s4807_s20, 4  ;;  %s4737_s26 = int_to_ptr.vmem [resolvable:$false] %s4736_s26 }
  0x4a   : > { %p4739_p0 = scmp.lt.s32.totalorder %s5523_s15, %s4737_s26 }
  0x4b   : > { %2214 = vrot.lane.b32.xlu1 %v4913_v4, %s4802_s28 }
  0x4d   : > { %2212 = vrot.lane.b32.xlu0 %v4908_v2, %s4802_s28 }
  0x4f   : > { %2412 = vrot.lane.b32.xlu1 %v4910_v3, %s4802_s28 }
  0x51   : > { %2210 = vrot.lane.b32.xlu0 %v4900_v1, %s4802_s28 }
  0x53   : > { %2410 = vrot.lane.b32.xlu1 %v4916_v5, %s4802_s28 }
  0x55   : > { %2414 = vrot.lane.b32.xlu0 %v4919_v6, %s4802_s28  ;;  %s4738_s28 = scalar_lea.vmem %s4737_s26, 768 }
  0x56   : > { %p4740_p1 = scmp.lt.s32.totalorder %s4738_s28, %s4732_s19 }
  0x57   : > { %2610 = vrot.lane.b32.xlu1 %v4913_v4, %s4803_s29 }
  0x58   : > { %p4741_p2 = por %p4740_p1, %p4739_p0 }
  0x59   : > { %2608 = vrot.lane.b32.xlu0 %v4908_v2, %s4803_s29 }
  0x5a   : > { %p4742_p3 = pnand %p4741_p2, %p4735_p13 }
  0x5b   : > { %2808 = vrot.lane.b32.xlu1 %v4910_v3, %s4803_s29 }
  0x5d   : > { %2606 = vrot.lane.b32.xlu0 %v4900_v1, %s4803_s29 }
  0x5f   : > { %2806 = vrot.lane.b32.xlu1 %v4916_v5, %s4803_s29 }
  0x61   : > { %2810 = vrot.lane.b32.xlu0 %v4919_v6, %s4803_s29 }
  0x63   : > { %3006 = vrot.lane.b32.xlu1 %v4913_v4, %s4804_s9 }
  0x65   : > { %3004 = vrot.lane.b32.xlu0 %v4908_v2, %s4804_s9 }
  0x67   : > { %3204 = vrot.lane.b32.xlu1 %v4910_v3, %s4804_s9 }
  0x69   : > { %3002 = vrot.lane.b32.xlu0 %v4900_v1, %s4804_s9 }
  0x6b   : > { %3202 = vrot.lane.b32.xlu1 %v4916_v5, %s4804_s9 }
  0x6d   : > { %3206 = vrot.lane.b32.xlu0 %v4919_v6, %s4804_s9 }
  0x6f   : > { %3402 = vrot.lane.b32.xlu1 %v4913_v4, %s4805_s10 }
  0x71   : > { %3400 = vrot.lane.b32.xlu0 %v4908_v2, %s4805_s10 }
  0x73   : > { %3600 = vrot.lane.b32.xlu1 %v4910_v3, %s4805_s10 }
  0x75   : > { %3398 = vrot.lane.b32.xlu0 %v4900_v1, %s4805_s10 }
  0x77   : > { %3598 = vrot.lane.b32.xlu1 %v4916_v5, %s4805_s10 }
  0x79   : > { %3602 = vrot.lane.b32.xlu0 %v4919_v6, %s4805_s10 }
  0x8d   : > { %v289_v8 = vpop.permute.xlu1 %288 }
  0x8f   : > { %v291_v7 = vpop.permute.xlu0 %290 }
  0x90   : > { %v295_v12 = vsel %vm294_vm2, %v289_v8, %v291_v7 }
  0x91   : > { %v665_v14 = vpop.permute.xlu1 %664 }
  0x93   : > { %v293_v10 = vpop.permute.xlu0 %292 }
  0x94   : > { %4268 = vmatpush3.msk.msra.mxu1 %vm307_vm1, %v293_v10  ;;  %v296_v11 = vsel %vm294_vm2, %v291_v7, %v293_v10  ;;  %v4081_v7 = vld [vmem:[%s5565_s2 + $0x60] sm:$0xff] }
  0x95   : > { %4006 = vmatprep.subr.msk.mxu0 %vm307_vm1, %v296_v11  ;;  %4270 = vmatmul.mubr.msk.f32.vlgmr.msra.gmra.mrb[0].mxu1 %vm297_vm3, %v4003_v9  ;;  %v663_v18 = vpop.permute.xlu1 %662  ;;  %v4082_v11 = vld [vmem:[%s5565_s2 + $0x68] sm:$0xff] }
  0x96   : > { %4007 = vmatpush1.msk.msra.mxu0 %vm307_vm1, %v295_v12  ;;  %4272 = vmatprep.mubr.msk.f32.mxu1 %vm4797_vm0, %v4796_v0  ;;  %v668_v20 = vsel %vm294_vm2, %v663_v18, %v665_v14 }
  0x97   : > { %4008 = vmatmul.mubr.msk.f32.vlgmr.msra.gmra.mrb[0].mxu0 %vm297_vm3, %v4003_v9  ;;  %4015 = vmatprep.subr.msk.mxu0 %vm307_vm1, %v4908_v2  ;;  %v667_v15 = vpop.permute.xlu0 %666 }
  0x98   : > { %4016 = vmatpush1.msk.msra.mxu0 %vm307_vm1, %v4900_v1  ;;  %4278 = vmatprep.subr.mxu1 %v4796_v0  ;;  %v669_v16 = vsel %vm294_vm2, %v665_v14, %v667_v15 }
  0x99   : > { %4273 = vmatmul.mubr.msk.f32.gmra.mrb[2].mxu1 %vm297_vm3, %v4004_v13  ;;  %384 = vmatprep.mubr.f32.mxu0 %v4796_v0  ;;  %v1027_v24 = vpop.permute.xlu1 %1026 }
  0x9a   : > { %4279 = vmatpush3.msk.msra.mxu1 %vm307_vm1, %v4913_v4  ;;  %4275 = vmatprep.mubr.msk.f32.mxu1 %vm4797_vm0, %v4796_v0 }
  0x9b   : > { %4009 = vmatmul.mubr.msk.f32.gmra.mrb[2].mxu0 %vm297_vm3, %v4004_v13  ;;  %683 = vmatprep.subr.mxu0 %v669_v16  ;;  %v1025_v25 = vpop.permute.xlu0 %1024  ;;  %v4083_v13 = vld [vmem:[%s5565_s2 + $0x70] sm:$0xff] }
  0x9c   : > { %390 = vmatprep.mubr.f32.mxu0 %v4796_v0  ;;  %4289 = vmatprep.subr.mxu1 %v4796_v0  ;;  %v1030_v27 = vsel %vm1028_vm5, %v1025_v25, %v1027_v24 }
  0x9d   : > { %4276 = vmatmul.mubr.msk.f32.gmra.mrb[4].mxu1 %vm297_vm3, %v4005_v17  ;;  %v1225_v33 = vpop.permute.xlu1 %1224 }
  0x9e   : > { %4280 = vmatprep.mubr.msk.f32.mxu1 %vm4797_vm0, %v4796_v0 }
  0x9f   : > { %4010 = vmatmul.mubr.msk.f32.gmra.mrb[4].mxu0 %vm297_vm3, %v4005_v17  ;;  %v1023_v29 = vpop.permute.xlu0 %1022 }
  0xa0   : > { %556 = vmatprep.mubr.f32.mxu0 %v4796_v0  ;;  %v1029_v32 = vsel %vm1028_vm5, %v1023_v29, %v1025_v25  ;;  %v4104_v29 = vld [vmem:[%s5565_s2 + $0x88] sm:$0xff] }
  0xa1   : > { %4281 = vmatmul.mubr.msk.f32.vlgmr.msra.gmra.mrb[0].mxu1 %vm297_vm3, %v275_v19  ;;  %v1223_v37 = vpop.permute.xlu1 %1222 }
  0xa2   : > { %4290 = vmatpush3.msra.mxu1 %v667_v15  ;;  %4283 = vmatprep.mubr.msk.f32.mxu1 %vm4797_vm0, %v4796_v0  ;;  %v1228_v40 = vsel %vm1028_vm5, %v1223_v37, %v1225_v33  ;;  %v4093_v15 = vld [vmem:[%s5566_s3 + $0x60] sm:$0xff]  ;;  %v4116_v37 = vld [vmem:[%s5566_s3 + $0x88] sm:$0xff] }
  0xa3   : > { %4017 = vmatmul.mubr.msk.f32.vlgmr.msra.gmra.mrb[0].mxu0 %vm297_vm3, %v275_v19  ;;  %4300 = vmatprep.subr.mxu1 %v4796_v0  ;;  %v1227_v31 = vpop.permute.xlu0 %1226  ;;  %v4094_v19 = vld [vmem:[%s5566_s3 + $0x68] sm:$0xff] }
  0xa4   : > { %684 = vmatpush1.msra.mxu0 %v668_v20  ;;  %562 = vmatprep.mubr.f32.mxu0 %v4796_v0  ;;  %v1229_v35 = vsel %vm1028_vm5, %v1225_v33, %v1227_v31 }
  0xa5   : > { %4284 = vmatmul.mubr.msk.f32.gmra.mrb[2].mxu1 %vm297_vm3, %v276_v21  ;;  %855 = vmatprep.subr.mxu0 %v4910_v3  ;;  %v1423_v39 = vpop.permute.xlu1 %1422  ;;  %v4073_v3 = vld [vmem:[%s5566_s3 + $0x50] sm:$0xff] }
  0xa6   : > { %4286 = vmatprep.mubr.msk.f32.mxu1 %vm4797_vm0, %v4796_v0 }
  0xa7   : > { %4018 = vmatmul.mubr.msk.f32.gmra.mrb[2].mxu0 %vm297_vm3, %v276_v21  ;;  %v1421_v41 = vpop.permute.xlu0 %1420  ;;  %v4095_v21 = vld [vmem:[%s5566_s3 + $0x70] sm:$0xff] }
  0xa8   : > { %568 = vmatprep.mubr.f32.mxu0 %v4796_v0  ;;  %v1426_v43 = vsel %vm1424_vm6, %v1421_v41, %v1423_v39 }
  0xa9   : > { %4287 = vmatmul.mubr.msk.f32.gmra.mrb[6].mxu1 %vm297_vm3, %v277_v22  ;;  %v1621_v49 = vpop.permute.xlu1 %1620 }
  0xaa   : > { %4291 = vmatprep.mubr.msk.f32.mxu1 %vm4797_vm0, %v4796_v0 }
  0xab   : > { %4019 = vmatmul.mubr.msk.f32.gmra.mrb[4].mxu0 %vm297_vm3, %v277_v22  ;;  %v1419_v45 = vpop.permute.xlu0 %1418 }
  0xac   : > { %747 = vmatprep.mubr.f32.mxu0 %v4796_v0  ;;  %v1425_v48 = vsel %vm1424_vm6, %v1419_v45, %v1421_v41  ;;  %v4806_v41 = vmov 0   ;;  %v4124_v45 = vld [vmem:[%s5565_s2 + $0x98] sm:$0xff] }
  0xad   : > { %4292 = vmatmul.mubr.msk.f32.vlgmr.msra.gmra.mrb[0].mxu1 %vm673_vm4, %v4024_v23  ;;  %v1619_v53 = vpop.permute.xlu1 %1618  ;;  %4699 = vset.pattern.permute.xlu0 %v4806_v41 }
  0xae   : > { %4294 = vmatprep.mubr.msk.f32.mxu1 %vm4797_vm0, %v4796_v0  ;;  %4301 = vmatpush3.msra.mxu1 %v4919_v6  ;;  %v1624_v56 = vsel %vm1424_vm6, %v1619_v53, %v1621_v49 }
  0xaf   : > { %4027 = vmatmul.mubr.msk.f32.vlgmr.msra.gmra.mrb[0].mxu0 %vm673_vm4, %v4024_v23  ;;  %4311 = vmatprep.subr.mxu1 %v4796_v0  ;;  %v1623_v47 = vpop.permute.xlu0 %1622  ;;  %v4102_v23 = vld [vmem:[%s5565_s2 + $0x78] sm:$0xff] }
  0xb0   : > { %856 = vmatpush1.msra.mxu0 %v4916_v5  ;;  %753 = vmatprep.mubr.f32.mxu0 %v4796_v0  ;;  %v1625_v51 = vsel %vm1424_vm6, %v1621_v49, %v1623_v47  ;;  %v4074_v5 = vld [vmem:[%s5566_s3 + $0x58] sm:$0xff]  ;;  %v3818_v49 = vld [vmem:[%s5568_s5 + $0x8] sm:$0xff] }
  0xb1   : > { %4295 = vmatmul.mubr.msk.f32.gmra.mrb[2].mxu1 %vm673_vm4, %v4025_v26  ;;  %4042 = vmatprep.subr.msk.mxu0 %vm307_vm1, %v1030_v27  ;;  %v1819_v55 = vpop.permute.xlu1 %1818  ;;  %v4103_v27 = vld [vmem:[%s5565_s2 + $0x80] sm:$0xff] }
  0xb2   : > { %4297 = vmatprep.mubr.msk.f32.mxu1 %vm4797_vm0, %v4796_v0  ;;  %4700 = vset.pattern.permute.xlu1 %v4806_v41 }
  0xb3   : > { %4028 = vmatmul.mubr.msk.f32.gmra.mrb[2].mxu0 %vm673_vm4, %v4025_v26  ;;  %v1817_v57 = vpop.permute.xlu0 %1816 }
  0xb4   : > { %759 = vmatprep.mubr.f32.mxu0 %v4796_v0  ;;  %v1822_v59 = vsel %vm1820_vm7, %v1817_v57, %v1819_v55 }
  0xb5   : > { %4298 = vmatmul.mubr.msk.f32.gmra.mrb[8].mxu1 %vm673_vm4, %v4026_v28  ;;  %v2017_v2 = vpop.permute.xlu1 %2016 }
  0xb6   : > { %4302 = vmatprep.mubr.msk.f32.mxu1 %vm4797_vm0, %v4796_v0 }
  0xb7   : > { %4029 = vmatmul.mubr.msk.f32.gmra.mrb[6].mxu0 %vm673_vm4, %v4026_v28  ;;  %v1815_v61 = vpop.permute.xlu0 %1814 }
  0xb8   : > { %919 = vmatprep.mubr.f32.mxu0 %v4796_v0  ;;  %v1821_v1 = vsel %vm1820_vm7, %v1815_v61, %v1817_v57  ;;  %v3792_v57 = vld [vmem:[%s5567_s4 + $0x10] sm:$0xff] }
  0xb9   : > { %4303 = vmatmul.mubr.msk.f32.vlgmr.msra.gmra.mrb[0].mxu1 %vm673_vm4, %v278_v30  ;;  %v2015_v6 = vpop.permute.xlu1 %2014  ;;  %v3819_v61 = vld [vmem:[%s5568_s5 + $0x10] sm:$0xff] }
  0xba   : > { %4312 = vmatpush3.msk.msra.mxu1 %vm307_vm1, %v1027_v24  ;;  %4305 = vmatprep.mubr.msk.f32.mxu1 %vm4797_vm0, %v4796_v0  ;;  %v5212_v9 = vsel %vm1820_vm7, %v2015_v6, %v2017_v2 }
  0xbb   : > { %4033 = vmatmul.mubr.msk.f32.vlgmr.msra.gmra.mrb[0].mxu0 %vm673_vm4, %v278_v30  ;;  %4322 = vmatprep.subr.mxu1 %v4796_v0  ;;  %v5175_v63 = vpop.permute.xlu0 %2018 }
  0xbc   : > { %4043 = vmatpush1.msk.msra.mxu0 %vm307_vm1, %v1029_v32  ;;  %925 = vmatprep.mubr.f32.mxu0 %v4796_v0  ;;  %v5188_v4 = vsel %vm1820_vm7, %v2017_v2, %v5175_v63 }
  0xbd   : > { %4306 = vmatmul.mubr.msk.f32.gmra.mrb[2].mxu1 %vm673_vm4, %v279_v34  ;;  %1242 = vmatprep.subr.mxu0 %v1229_v35  ;;  %v2215_v8 = vpop.permute.xlu1 %2214  ;;  %v4115_v35 = vld [vmem:[%s5566_s3 + $0x80] sm:$0xff] }
  0xbe   : > { %4308 = vmatprep.mubr.msk.f32.mxu1 %vm4797_vm0, %v4796_v0 }
  0xbf   : > { %4034 = vmatmul.mubr.msk.f32.gmra.mrb[2].mxu0 %vm673_vm4, %v279_v34  ;;  %v2213_v10 = vpop.permute.xlu0 %2212 }
  0xc0   : > { %931 = vmatprep.mubr.f32.mxu0 %v4796_v0  ;;  %v2218_v12 = vsel %vm2216_vm8, %v2213_v10, %v2215_v8 }
  0xc1   : > { %4309 = vmatmul.mubr.msk.f32.gmra.mrb[10].mxu1 %vm673_vm4, %v280_v36  ;;  %v2413_v18 = vpop.permute.xlu1 %2412 }
  0xc2   : > { %4313 = vmatprep.mubr.msk.f32.mxu1 %vm4797_vm0, %v4796_v0 }
  0xc3   : > { %4035 = vmatmul.mubr.msk.f32.gmra.mrb[6].mxu0 %vm673_vm4, %v280_v36  ;;  %v2211_v14 = vpop.permute.xlu0 %2210 }
  0xc4   : > { %1110 = vmatprep.mubr.f32.mxu0 %v4796_v0  ;;  %v2217_v17 = vsel %vm2216_vm8, %v2211_v14, %v2213_v10  ;;  %v4156_v10 = vld [vmem:[%s5566_s3 + $0xa8] sm:$0xff]  ;;  %v4157_v14 = vld [vmem:[%s5566_s3 + $0xb0] sm:$0xff] }
  0xc5   : > { %4314 = vmatmul.mubr.msk.f32.vlgmr.msra.gmra.mrb[0].mxu1 %vm297_vm3, %v4039_v38  ;;  %v2411_v22 = vpop.permute.xlu1 %2410 }
  0xc6   : > { %4323 = vmatpush3.msra.mxu1 %v1227_v31  ;;  %4316 = vmatprep.mubr.msk.f32.mxu1 %vm4797_vm0, %v4796_v0  ;;  %v2416_v25 = vsel %vm2216_vm8, %v2411_v22, %v2413_v18  ;;  %v4114_v31 = vld [vmem:[%s5566_s3 + $0x78] sm:$0xff]  ;;  %v4177_v22 = vld [vmem:[%s5566_s3 + $0xc0] sm:$0xff] }
  0xc7   : > { %4044 = vmatmul.mubr.msk.f32.vlgmr.msra.gmra.mrb[0].mxu0 %vm297_vm3, %v4039_v38  ;;  %4333 = vmatprep.subr.mxu1 %v4796_v0  ;;  %v2415_v16 = vpop.permute.xlu0 %2414 }
  0xc8   : > { %1243 = vmatpush1.msra.mxu0 %v1228_v40  ;;  %1116 = vmatprep.mubr.f32.mxu0 %v4796_v0  ;;  %v2417_v20 = vsel %vm2216_vm8, %v2413_v18, %v2415_v16  ;;  %v4123_v40 = vld [vmem:[%s5565_s2 + $0x90] sm:$0xff]  ;;  %v4165_v18 = vld [vmem:[%s5565_s2 + $0xc0] sm:$0xff] }
  0xc9   : > { %4317 = vmatmul.mubr.msk.f32.gmra.mrb[2].mxu1 %vm297_vm3, %v4040_v42  ;;  %4063 = vmatprep.subr.msk.mxu0 %vm307_vm1, %v1426_v43  ;;  %v2611_v24 = vpop.permute.xlu1 %2610 }
  0xca   : > { %4319 = vmatprep.mubr.msk.f32.mxu1 %vm4797_vm0, %v4796_v0 }
  0xcb   : > { %4045 = vmatmul.mubr.msk.f32.gmra.mrb[2].mxu0 %vm297_vm3, %v4040_v42  ;;  %v2609_v26 = vpop.permute.xlu0 %2608 }
  0xcc   : > { %1122 = vmatprep.mubr.f32.mxu0 %v4796_v0  ;;  %v2614_v28 = vsel %vm2612_vm9, %v2609_v26, %v2611_v24 }
  0xcd   : > { %4320 = vmatmul.mubr.msk.f32.gmra.mrb[12].mxu1 %vm297_vm3, %v4041_v44  ;;  %v2809_v34 = vpop.permute.xlu1 %2808 }
  0xce   : > { %4324 = vmatprep.mubr.msk.f32.mxu1 %vm4797_vm0, %v4796_v0 }
  0xcf   : > { %4046 = vmatmul.mubr.msk.f32.gmra.mrb[4].mxu0 %vm297_vm3, %v4041_v44  ;;  %v2607_v30 = vpop.permute.xlu0 %2606 }
  0xd0   : > { %1306 = vmatprep.mubr.f32.mxu0 %v4796_v0  ;;  %v2613_v33 = vsel %vm2612_vm9, %v2607_v30, %v2609_v26 }
  0xd1   : > { %4325 = vmatmul.mubr.msk.f32.vlgmr.msra.gmra.mrb[0].mxu1 %vm673_vm4, %v4051_v46  ;;  %v2807_v38 = vpop.permute.xlu1 %2806 }
  0xd2   : > { %4334 = vmatpush3.msk.msra.mxu1 %vm307_vm1, %v1423_v39  ;;  %4327 = vmatprep.mubr.msk.f32.mxu1 %vm4797_vm0, %v4796_v0  ;;  %v3790_v39 = vld [vmem:[%s5567_s4] sm:$0xff]  ;;  %v2812_v43 = vsel %vm2612_vm9, %v2807_v38, %v2809_v34 }
  0xd3   : > { %4054 = vmatmul.mubr.msk.f32.vlgmr.msra.gmra.mrb[0].mxu0 %vm673_vm4, %v4051_v46  ;;  %4344 = vmatprep.subr.mxu1 %v4796_v0  ;;  %v2811_v32 = vpop.permute.xlu0 %2810 }
  0xd4   : > { %4064 = vmatpush1.msk.msra.mxu0 %vm307_vm1, %v1425_v48  ;;  %1312 = vmatprep.mubr.f32.mxu0 %v4796_v0  ;;  %v2813_v36 = vsel %vm2612_vm9, %v2809_v34, %v2811_v32 }
  0xd5   : > { %4328 = vmatmul.mubr.msk.f32.gmra.mrb[2].mxu1 %vm673_vm4, %v4052_v50  ;;  %1638 = vmatprep.subr.mxu0 %v1625_v51  ;;  %v3007_v42 = vpop.permute.xlu1 %3006  ;;  %v4135_v51 = vld [vmem:[%s5566_s3 + $0x90] sm:$0xff] }
  0xd6   : > { %4330 = vmatprep.mubr.msk.f32.mxu1 %vm4797_vm0, %v4796_v0  ;;  %3795 = vperm.xlu0 %4699, %v3790_v39  }
  0xd7   : > { %4055 = vmatmul.mubr.msk.f32.gmra.mrb[2].mxu0 %vm673_vm4, %v4052_v50  ;;  %v3005_v44 = vpop.permute.xlu0 %3004  ;;  %v3817_v50 = vld [vmem:[%s5568_s5] sm:$0xff] }
  0xd8   : > { %1318 = vmatprep.mubr.f32.mxu0 %v4796_v0  ;;  %v3010_v46 = vsel %vm3008_vm10, %v3005_v44, %v3007_v42  ;;  %3822 = vperm.xlu1 %4700, %v3817_v50  }
  0xd9   : > { %4331 = vmatmul.mubr.msk.f32.gmra.mrb[14].mxu1 %vm673_vm4, %v4053_v52 }
  0xda   : > { %4335 = vmatprep.mubr.msk.f32.mxu1 %vm4797_vm0, %v4796_v0  ;;  %3827 = vperm.xlu0 %4699, %v3818_v49  }
  0xdb   : > { %4056 = vmatmul.mubr.msk.f32.gmra.mrb[6].mxu0 %vm673_vm4, %v4053_v52  ;;  %v3003_v48 = vpop.permute.xlu0 %3002 }
  0xdc   : > { %1506 = vmatprep.mubr.f32.mxu0 %v4796_v0  ;;  %v3009_v53 = vsel %vm3008_vm10, %v3003_v48, %v3005_v44 }
  0xdd   : > { %4336 = vmatmul.mubr.msk.f32.vlgmr.msra.gmra.mrb[0].mxu1 %vm297_vm3, %v4060_v54 }
  0xde   : > { %4345 = vmatpush3.msra.mxu1 %v1623_v47  ;;  %4338 = vmatprep.mubr.msk.f32.mxu1 %vm4797_vm0, %v4796_v0  ;;  %v4125_v47 = vld [vmem:[%s5565_s2 + $0xa0] sm:$0xff] }
  0xdf   : > { %4065 = vmatmul.mubr.msk.f32.vlgmr.msra.gmra.mrb[0].mxu0 %vm297_vm3, %v4060_v54  ;;  %4355 = vmatprep.subr.mxu1 %v4796_v0  ;;  %v3207_v52 = vpop.permute.xlu0 %3206  ;;  %v3205_v54 = vpop.permute.xlu1 %3204 }
  0xe0   : > { %1639 = vmatpush1.msra.mxu0 %v1624_v56  ;;  %1512 = vmatprep.mubr.f32.mxu0 %v4796_v0  ;;  %v3209_v56 = vsel %vm3008_vm10, %v3205_v54, %v3207_v52 }
  0xe1   : > { %4339 = vmatmul.mubr.msk.f32.gmra.mrb[2].mxu1 %vm297_vm3, %v4061_v58  ;;  %4084 = vmatprep.subr.msk.mxu0 %vm307_vm1, %v1822_v59  ;;  %v4137_v59 = vld [vmem:[%s5566_s3 + $0xa0] sm:$0xff] }
  0xe2   : > { %4341 = vmatprep.mubr.msk.f32.mxu1 %vm4797_vm0, %v4796_v0  ;;  %3805 = vperm.xlu0 %4699, %v3792_v57  }
  0xe3   : > { %4066 = vmatmul.mubr.msk.f32.gmra.mrb[2].mxu0 %vm297_vm3, %v4061_v58  ;;  %v3791_v58 = vld [vmem:[%s5567_s4 + $0x8] sm:$0xff] }
  0xe4   : > { %1518 = vmatprep.mubr.f32.mxu0 %v4796_v0  ;;  %3800 = vperm.xlu1 %4700, %v3791_v58  }
  0xe5   : > { %4342 = vmatmul.mubr.msk.f32.gmra.mrb[16].mxu1 %vm297_vm3, %v4062_v60 }
  0xe6   : > { %4346 = vmatprep.mubr.msk.f32.mxu1 %vm4797_vm0, %v4796_v0 }
  0xe7   : > { %4067 = vmatmul.mubr.msk.f32.gmra.mrb[4].mxu0 %vm297_vm3, %v4062_v60  ;;  %v3203_v60 = vpop.permute.xlu1 %3202 }
  0xe8   : > { %1702 = vmatprep.mubr.f32.mxu0 %v4796_v0  ;;  %3832 = vperm.xlu1 %4700, %v3819_v61   ;;  %v3208_v2 = vsel %vm3008_vm10, %v3203_v60, %v3205_v54 }
  0xe9   : > { %4347 = vmatmul.mubr.msk.f32.vlgmr.msra.gmra.mrb[0].mxu1 %vm673_vm4, %v4072_v62 }
  0xea   : > { %4356 = vmatpush3.msk.msra.mxu1 %vm307_vm1, %v1819_v55  ;;  %4349 = vmatprep.mubr.msk.f32.mxu1 %vm4797_vm0, %v4796_v0  ;;  %v4136_v55 = vld [vmem:[%s5566_s3 + $0x98] sm:$0xff] }
  0xeb   : > { %4075 = vmatmul.mubr.msk.f32.vlgmr.msra.gmra.mrb[0].mxu0 %vm673_vm4, %v4072_v62  ;;  %4366 = vmatprep.subr.mxu1 %v4796_v0  ;;  %v4144_v62 = vld [vmem:[%s5565_s2 + $0xa8] sm:$0xff] }
  0xec   : > { %4085 = vmatpush1.msk.msra.mxu0 %vm307_vm1, %v1821_v1  ;;  %1708 = vmatprep.mubr.f32.mxu0 %v4796_v0  ;;  %v3403_v1 = vpop.permute.xlu1 %3402 }
  0xed   : > { %4350 = vmatmul.mubr.msk.f32.gmra.mrb[2].mxu1 %vm673_vm4, %v4073_v3  ;;  %2034 = vmatprep.subr.mxu0 %v5188_v4 }
  0xee   : > { %4352 = vmatprep.mubr.msk.f32.mxu1 %vm4797_vm0, %v4796_v0 }
  0xef   : > { %4076 = vmatmul.mubr.msk.f32.gmra.mrb[2].mxu0 %vm673_vm4, %v4073_v3  ;;  %v3401_v3 = vpop.permute.xlu0 %3400 }
  0xf0   : > { %1714 = vmatprep.mubr.f32.mxu0 %v4796_v0  ;;  %v3406_v6 = vsel %vm3404_vm11, %v3401_v3, %v3403_v1 }
  0xf1   : > { %4353 = vmatmul.mubr.msk.f32.gmra.mrb[18].mxu1 %vm673_vm4, %v4074_v5 }
  0xf2   : > { %4357 = vmatprep.mubr.msk.f32.mxu1 %vm4797_vm0, %v4796_v0 }
  0xf3   : > { %4077 = vmatmul.mubr.msk.f32.gmra.mrb[6].mxu0 %vm673_vm4, %v4074_v5  ;;  %v4145_v5 = vld [vmem:[%s5565_s2 + $0xb0] sm:$0xff] }
  0xf4   : > { %1902 = vmatprep.mubr.f32.mxu0 %v4796_v0 }
  0xf5   : > { %4358 = vmatmul.mubr.msk.f32.vlgmr.msra.gmra.mrb[0].mxu1 %vm297_vm3, %v4081_v7 }
  0xf6   : > { %4367 = vmatpush3.msra.mxu1 %v5175_v63  ;;  %4360 = vmatprep.mubr.msk.f32.mxu1 %vm4797_vm0, %v4796_v0 }
  0xf7   : > { %4086 = vmatmul.mubr.msk.f32.vlgmr.msra.gmra.mrb[0].mxu0 %vm297_vm3, %v4081_v7  ;;  %4377 = vmatprep.subr.mxu1 %v4796_v0  ;;  %v4146_v7 = vld [vmem:[%s5565_s2 + $0xb8] sm:$0xff] }
  0xf8   : > { %2035 = vmatpush1.msra.mxu0 %v5212_v9  ;;  %1908 = vmatprep.mubr.f32.mxu0 %v4796_v0 }
  0xf9   : > { %4361 = vmatmul.mubr.msk.f32.gmra.mrb[2].mxu1 %vm297_vm3, %v4082_v11  ;;  %4105 = vmatprep.subr.msk.mxu0 %vm307_vm1, %v2218_v12 }
  0xfa   : > { %4363 = vmatprep.mubr.msk.f32.mxu1 %vm4797_vm0, %v4796_v0 }
  0xfb   : > { %4087 = vmatmul.mubr.msk.f32.gmra.mrb[2].mxu0 %vm297_vm3, %v4082_v11 }
  0xfc   : > { %1914 = vmatprep.mubr.f32.mxu0 %v4796_v0 }
  0xfd   : > { %4364 = vmatmul.mubr.msk.f32.gmra.mrb[20].mxu1 %vm297_vm3, %v4083_v13 }
  0xfe   : > { %4368 = vmatprep.mubr.msk.f32.mxu1 %vm4797_vm0, %v4796_v0 }
  0xff   : > { %4088 = vmatmul.mubr.msk.f32.gmra.mrb[4].mxu0 %vm297_vm3, %v4083_v13  ;;  %v3601_v13 = vpop.permute.xlu1 %3600 }
 0x100   : > { %2098 = vmatprep.mubr.f32.mxu0 %v4796_v0 }
 0x101   : > { %4369 = vmatmul.mubr.msk.f32.vlgmr.msra.gmra.mrb[0].mxu1 %vm673_vm4, %v4093_v15 }
 0x102   : > { %4378 = vmatpush3.msk.msra.mxu1 %vm307_vm1, %v2215_v8  ;;  %4371 = vmatprep.mubr.msk.f32.mxu1 %vm4797_vm0, %v4796_v0  ;;  %v3399_v8 = vpop.permute.xlu0 %3398 }
 0x103   : > { %4096 = vmatmul.mubr.msk.f32.vlgmr.msra.gmra.mrb[0].mxu0 %vm673_vm4, %v4093_v15  ;;  %4388 = vmatprep.subr.mxu1 %v4796_v0  ;;  %v3405_v12 = vsel %vm3404_vm11, %v3399_v8, %v3401_v3 }
 0x104   : > { %4106 = vmatpush1.msk.msra.mxu0 %vm307_vm1, %v2217_v17  ;;  %2104 = vmatprep.mubr.f32.mxu0 %v4796_v0  ;;  %v3599_v17 = vpop.permute.xlu1 %3598 }
 0x105   : > { %4372 = vmatmul.mubr.msk.f32.gmra.mrb[2].mxu1 %vm673_vm4, %v4094_v19  ;;  %2430 = vmatprep.subr.mxu0 %v2417_v20  ;;  %v4166_v20 = vld [vmem:[%s5565_s2 + $0xc8] sm:$0xff] }
 0x106   : > { %4374 = vmatprep.mubr.msk.f32.mxu1 %vm4797_vm0, %v4796_v0  ;;  %v3603_v11 = vpop.permute.xlu0 %3602 }
 0x107   : > { %4097 = vmatmul.mubr.msk.f32.gmra.mrb[2].mxu0 %vm673_vm4, %v4094_v19  ;;  %v3605_v15 = vsel %vm3404_vm11, %v3601_v13, %v3603_v11  ;;  %v3604_v19 = vsel %vm3404_vm11, %v3599_v17, %v3601_v13 }
 0x108   : > { %2110 = vmatprep.mubr.f32.mxu0 %v4796_v0 }
 0x109   : > { %4375 = vmatmul.mubr.msk.f32.gmra.mrb[22].mxu1 %vm673_vm4, %v4095_v21 }
 0x10a   : > { %4379 = vmatprep.mubr.msk.f32.mxu1 %vm4797_vm0, %v4796_v0 }
 0x10b   : > { %4098 = vmatmul.mubr.msk.f32.gmra.mrb[6].mxu0 %vm673_vm4, %v4095_v21  ;;  %v4167_v21 = vld [vmem:[%s5565_s2 + $0xd0] sm:$0xff] }
 0x10c   : > { %2298 = vmatprep.mubr.f32.mxu0 %v4796_v0 }
 0x10d   : > { %4380 = vmatmul.mubr.msk.f32.vlgmr.msra.gmra.mrb[0].mxu1 %vm297_vm3, %v4102_v23 }
 0x10e   : > { %4389 = vmatpush3.msra.mxu1 %v2415_v16  ;;  %4382 = vmatprep.mubr.msk.f32.mxu1 %vm4797_vm0, %v4796_v0  ;;  %v4158_v16 = vld [vmem:[%s5566_s3 + $0xb8] sm:$0xff] }
 0x10f   : > { %4107 = vmatmul.mubr.msk.f32.vlgmr.msra.gmra.mrb[0].mxu0 %vm297_vm3, %v4102_v23  ;;  %4399 = vmatprep.subr.mxu1 %v4796_v0  ;;  %v4178_v23 = vld [vmem:[%s5566_s3 + $0xc8] sm:$0xff] }
 0x110   : > { %2431 = vmatpush1.msra.mxu0 %v2416_v25  ;;  %2304 = vmatprep.mubr.f32.mxu0 %v4796_v0 }
 0x111   : > { %4383 = vmatmul.mubr.msk.f32.gmra.mrb[2].mxu1 %vm297_vm3, %v4103_v27  ;;  %4126 = vmatprep.subr.msk.mxu0 %vm307_vm1, %v2614_v28 }
 0x112   : > { %4385 = vmatprep.mubr.msk.f32.mxu1 %vm4797_vm0, %v4796_v0 }
 0x113   : > { %4108 = vmatmul.mubr.msk.f32.gmra.mrb[2].mxu0 %vm297_vm3, %v4103_v27 }
 0x114   : > { %2310 = vmatprep.mubr.f32.mxu0 %v4796_v0 }
 0x115   : > { %4386 = vmatmul.mubr.msk.f32.gmra.mrb[24].mxu1 %vm297_vm3, %v4104_v29 }
 0x116   : > { %4390 = vmatprep.mubr.msk.f32.mxu1 %vm4797_vm0, %v4796_v0 }
 0x117   : > { %4109 = vmatmul.mubr.msk.f32.gmra.mrb[4].mxu0 %vm297_vm3, %v4104_v29 }
 0x118   : > { %2494 = vmatprep.mubr.f32.mxu0 %v4796_v0 }
 0x119   : > { %4391 = vmatmul.mubr.msk.f32.vlgmr.msra.gmra.mrb[0].mxu1 %vm673_vm4, %v4114_v31 }
 0x11a   : > { %4400 = vmatpush3.msk.msra.mxu1 %vm307_vm1, %v2611_v24  ;;  %4393 = vmatprep.mubr.msk.f32.mxu1 %vm4797_vm0, %v4796_v0  ;;  %v4179_v24 = vld [vmem:[%s5566_s3 + $0xd0] sm:$0xff] }
 0x11b   : > { %4117 = vmatmul.mubr.msk.f32.vlgmr.msra.gmra.mrb[0].mxu0 %vm673_vm4, %v4114_v31  ;;  %4410 = vmatprep.subr.mxu1 %v4796_v0 }
 0x11c   : > { %4127 = vmatpush1.msk.msra.mxu0 %vm307_vm1, %v2613_v33  ;;  %2500 = vmatprep.mubr.f32.mxu0 %v4796_v0 }
 0x11d   : > { %4394 = vmatmul.mubr.msk.f32.gmra.mrb[2].mxu1 %vm673_vm4, %v4115_v35  ;;  %2826 = vmatprep.subr.mxu0 %v2813_v36 }
 0x11e   : > { %4396 = vmatprep.mubr.msk.f32.mxu1 %vm4797_vm0, %v4796_v0 }
 0x11f   : > { %4118 = vmatmul.mubr.msk.f32.gmra.mrb[2].mxu0 %vm673_vm4, %v4115_v35 }
 0x120   : > { %2506 = vmatprep.mubr.f32.mxu0 %v4796_v0 }
 0x121   : > { %4397 = vmatmul.mubr.msk.f32.gmra.mrb[26].mxu1 %vm673_vm4, %v4116_v37 }
 0x122   : > { %4401 = vmatprep.mubr.msk.f32.mxu1 %vm4797_vm0, %v4796_v0 }
 0x123   : > { %4119 = vmatmul.mubr.msk.f32.gmra.mrb[6].mxu0 %vm673_vm4, %v4116_v37 }
 0x124   : > { %2694 = vmatprep.mubr.f32.mxu0 %v4796_v0 }
 0x125   : > { %4402 = vmatmul.mubr.msk.f32.vlgmr.msra.gmra.mrb[0].mxu1 %vm297_vm3, %v4123_v40 }
 0x126   : > { %4411 = vmatpush3.msra.mxu1 %v2811_v32  ;;  %4404 = vmatprep.mubr.msk.f32.mxu1 %vm4797_vm0, %v4796_v0 }
 0x127   : > { %4128 = vmatmul.mubr.msk.f32.vlgmr.msra.gmra.mrb[0].mxu0 %vm297_vm3, %v4123_v40  ;;  %4421 = vmatprep.subr.mxu1 %v4796_v0 }
 0x128   : > { %2827 = vmatpush1.msra.mxu0 %v2812_v43  ;;  %2700 = vmatprep.mubr.f32.mxu0 %v4796_v0 }
 0x129   : > { %4405 = vmatmul.mubr.msk.f32.gmra.mrb[2].mxu1 %vm297_vm3, %v4124_v45  ;;  %4147 = vmatprep.subr.msk.mxu0 %vm307_vm1, %v3010_v46 }
 0x12a   : > { %4407 = vmatprep.mubr.msk.f32.mxu1 %vm4797_vm0, %v4796_v0 }
 0x12b   : > { %4129 = vmatmul.mubr.msk.f32.gmra.mrb[2].mxu0 %vm297_vm3, %v4124_v45 }
 0x12c   : > { %2706 = vmatprep.mubr.f32.mxu0 %v4796_v0 }
 0x12d   : > { %4408 = vmatmul.mubr.msk.f32.gmra.mrb[28].mxu1 %vm297_vm3, %v4125_v47 }
 0x12e   : > { %4412 = vmatprep.mubr.msk.f32.mxu1 %vm4797_vm0, %v4796_v0 }
 0x12f   : > { %4130 = vmatmul.mubr.msk.f32.gmra.mrb[4].mxu0 %vm297_vm3, %v4125_v47 }
 0x130   : > { %2890 = vmatprep.mubr.f32.mxu0 %v4796_v0 }
 0x131   : > { %4413 = vmatmul.mubr.msk.f32.vlgmr.msra.gmra.mrb[0].mxu1 %vm673_vm4, %v4135_v51 }
 0x132   : > { %4422 = vmatpush3.msk.msra.mxu1 %vm307_vm1, %v3007_v42  ;;  %4415 = vmatprep.mubr.msk.f32.mxu1 %vm4797_vm0, %v4796_v0 }
 0x133   : > { %4138 = vmatmul.mubr.msk.f32.vlgmr.msra.gmra.mrb[0].mxu0 %vm673_vm4, %v4135_v51  ;;  %4432 = vmatprep.subr.mxu1 %v4796_v0 }
 0x134   : > { %4148 = vmatpush1.msk.msra.mxu0 %vm307_vm1, %v3009_v53  ;;  %2896 = vmatprep.mubr.f32.mxu0 %v4796_v0 }
 0x135   : > { %4416 = vmatmul.mubr.msk.f32.gmra.mrb[2].mxu1 %vm673_vm4, %v4136_v55  ;;  %3222 = vmatprep.subr.mxu0 %v3209_v56 }
 0x136   : > { %4418 = vmatprep.mubr.msk.f32.mxu1 %vm4797_vm0, %v4796_v0 }
 0x137   : > { %4139 = vmatmul.mubr.msk.f32.gmra.mrb[2].mxu0 %vm673_vm4, %v4136_v55 }
 0x138   : > { %2902 = vmatprep.mubr.f32.mxu0 %v4796_v0 }
 0x139   : > { %4419 = vmatmul.mubr.msk.f32.gmra.mrb[30].mxu1 %vm673_vm4, %v4137_v59 }
 0x13a   : > { %4423 = vmatprep.mubr.msk.f32.mxu1 %vm4797_vm0, %v4796_v0 }
 0x13b   : > { %4140 = vmatmul.mubr.msk.f32.gmra.mrb[6].mxu0 %vm673_vm4, %v4137_v59 }
 0x13c   : > { %3090 = vmatprep.mubr.f32.mxu0 %v4796_v0 }
 0x13d   : > { %4424 = vmatmul.mubr.msk.f32.vlgmr.msra.gmra.mrb[0].mxu1 %vm297_vm3, %v4144_v62 }
 0x13e   : > { %4433 = vmatpush3.msra.mxu1 %v3207_v52  ;;  %4426 = vmatprep.mubr.msk.f32.mxu1 %vm4797_vm0, %v4796_v0 }
 0x13f   : > { %4149 = vmatmul.mubr.msk.f32.vlgmr.msra.gmra.mrb[0].mxu0 %vm297_vm3, %v4144_v62  ;;  %4443 = vmatprep.subr.mxu1 %v4796_v0 }
 0x140   : > { %3223 = vmatpush1.msra.mxu0 %v3208_v2  ;;  %3096 = vmatprep.mubr.f32.mxu0 %v4796_v0 }
 0x141   : > { %4427 = vmatmul.mubr.msk.f32.gmra.mrb[2].mxu1 %vm297_vm3, %v4145_v5  ;;  %4168 = vmatprep.subr.msk.mxu0 %vm307_vm1, %v3406_v6 }
 0x142   : > { %4429 = vmatprep.mubr.msk.f32.mxu1 %vm4797_vm0, %v4796_v0 }
 0x143   : > { %4150 = vmatmul.mubr.msk.f32.gmra.mrb[2].mxu0 %vm297_vm3, %v4145_v5 }
 0x144   : > { %3102 = vmatprep.mubr.f32.mxu0 %v4796_v0 }
 0x145   : > { %4430 = vmatmul.mubr.msk.f32.gmra.mrb[32].mxu1 %vm297_vm3, %v4146_v7 }
 0x146   : > { %4434 = vmatprep.mubr.msk.f32.mxu1 %vm4797_vm0, %v4796_v0 }
 0x147   : > { %4151 = vmatmul.mubr.msk.f32.gmra.mrb[4].mxu0 %vm297_vm3, %v4146_v7 }
 0x148   : > { %3286 = vmatprep.mubr.f32.mxu0 %v4796_v0 }
 0x149   : > { %4435 = vmatmul.mubr.msk.f32.vlgmr.msra.gmra.mrb[0].mxu1 %vm673_vm4, %v4156_v10 }
 0x14a   : > { %4444 = vmatpush3.msk.msra.mxu1 %vm307_vm1, %v3403_v1  ;;  %4437 = vmatprep.mubr.msk.f32.mxu1 %vm4797_vm0, %v4796_v0 }
 0x14b   : > { %4159 = vmatmul.mubr.msk.f32.vlgmr.msra.gmra.mrb[0].mxu0 %vm673_vm4, %v4156_v10  ;;  %4454 = vmatprep.subr.mxu1 %v4796_v0 }
 0x14c   : > { %4169 = vmatpush1.msk.msra.mxu0 %vm307_vm1, %v3405_v12  ;;  %3292 = vmatprep.mubr.f32.mxu0 %v4796_v0 }
 0x14d   : > { %4438 = vmatmul.mubr.msk.f32.gmra.mrb[2].mxu1 %vm673_vm4, %v4157_v14  ;;  %3618 = vmatprep.subr.mxu0 %v3605_v15 }
 0x14e   : > { %4440 = vmatprep.mubr.msk.f32.mxu1 %vm4797_vm0, %v4796_v0 }
 0x14f   : > { %4160 = vmatmul.mubr.msk.f32.gmra.mrb[2].mxu0 %vm673_vm4, %v4157_v14 }
 0x150   : > { %3298 = vmatprep.mubr.f32.mxu0 %v4796_v0 }
 0x151   : > { %4441 = vmatmul.mubr.msk.f32.gmra.mrb[34].mxu1 %vm673_vm4, %v4158_v16 }
 0x152   : > { %4445 = vmatprep.mubr.msk.f32.mxu1 %vm4797_vm0, %v4796_v0 }
 0x153   : > { %4161 = vmatmul.mubr.msk.f32.gmra.mrb[6].mxu0 %vm673_vm4, %v4158_v16 }
 0x154   : > { %3486 = vmatprep.mubr.f32.mxu0 %v4796_v0 }
 0x155   : > { %4446 = vmatmul.mubr.msk.f32.vlgmr.msra.gmra.mrb[0].mxu1 %vm297_vm3, %v4165_v18  ;;  %v3796_v16 = vpop.permute.xlu0 %3795 }
 0x156   : > { %4455 = vmatpush3.msra.mxu1 %v3603_v11  ;;  %4448 = vmatprep.mubr.msk.f32.mxu1 %vm4797_vm0, %v4796_v0 }
 0x157   : > { %4170 = vmatmul.mubr.msk.f32.vlgmr.msra.gmra.mrb[0].mxu0 %vm297_vm3, %v4165_v18  ;;  %v3823_v13 = vpop.permute.xlu1 %3822 }
 0x158   : > { %3619 = vmatpush1.msra.mxu0 %v3604_v19  ;;  %3492 = vmatprep.mubr.f32.mxu0 %v4796_v0 }
 0x159   : > { %4449 = vmatmul.mubr.msk.f32.gmra.mrb[2].mxu1 %vm297_vm3, %v4166_v20 }
 0x15a   : > { %4451 = vmatprep.mubr.msk.f32.mxu1 %vm4797_vm0, %v4796_v0 }
 0x15b   : > { %4171 = vmatmul.mubr.msk.f32.gmra.mrb[2].mxu0 %vm297_vm3, %v4166_v20 }
 0x15c   : > { %3498 = vmatprep.mubr.f32.mxu0 %v4796_v0 }
 0x15d   : > { %4452 = vmatmul.mubr.msk.f32.gmra.mrb[36].mxu1 %vm297_vm3, %v4167_v21 }
 0x15e   : > { %4456 = vmatprep.mubr.msk.f32.mxu1 %vm4797_vm0, %v4796_v0 }
 0x15f   : > { %4172 = vmatmul.mubr.msk.f32.gmra.mrb[4].mxu0 %vm297_vm3, %v4167_v21 }
 0x160   : > { %3682 = vmatprep.mubr.f32.mxu0 %v4796_v0 }
 0x161   : > { %4457 = vmatmul.mubr.msk.f32.vlgmr.msra.gmra.mrb[0].mxu1 %vm673_vm4, %v4177_v22 }
 0x162   : > { %4459 = vmatprep.mubr.msk.f32.mxu1 %vm4797_vm0, %v4796_v0 }
 0x163   : > { %4180 = vmatmul.mubr.msk.f32.vlgmr.msra.gmra.mrb[0].mxu0 %vm673_vm4, %v4177_v22 }
 0x164   : > { %3688 = vmatprep.mubr.f32.mxu0 %v4796_v0 }
 0x165   : > { %4460 = vmatmul.mubr.msk.f32.gmra.mrb[2].mxu1 %vm673_vm4, %v4178_v23 }
 0x166   : > { %4462 = vmatprep.mubr.msk.f32.mxu1 %vm4797_vm0, %v4796_v0 }
 0x167   : > { %4181 = vmatmul.mubr.msk.f32.gmra.mrb[2].mxu0 %vm673_vm4, %v4178_v23 }
 0x168   : > { %3694 = vmatprep.mubr.f32.mxu0 %v4796_v0 }
 0x169   : > { %4463 = vmatmul.mubr.msk.f32.gmra.mrb[38].mxu1 %vm673_vm4, %v4179_v24 }
 0x16b   : > { %4182 = vmatmul.mubr.msk.f32.gmra.mrb[6].mxu0 %vm673_vm4, %v4179_v24  ;;  %v3801_v24 = vpop.permute.xlu1 %3800 }
 0x170   : > { %v473_v25 = vpop.f32.mrb[4].mxu1 }
 0x171   : > { %v4277_v26 = vpop.f32.mrb[5].mxu1 }
 0x17c   : > { %v651_v27 = vpop.f32.mrb[6].mxu1 }
 0x17d   : > { %v652_v28 = vadd.f32 %v651_v27, %v473_v25  ;;  %v4288_v29 = vpop.f32.mrb[7].mxu1 }
 0x188   : > { %v842_v30 = vpop.f32.mrb[8].mxu1 }
 0x189   : > { %v4299_v31 = vpop.f32.mrb[9].mxu1 }
 0x18a   : > { %v3828_v31 = vpop.permute.xlu0 %3827 }
 0x194   : > { %v1014_v32 = vpop.f32.mrb[10].mxu1 }
 0x195   : > { %v1015_v33 = vadd.f32 %v1014_v32, %v842_v30  ;;  %v4310_v34 = vpop.f32.mrb[11].mxu1 }
 0x1a0   : > { %v1205_v35 = vpop.f32.mrb[12].mxu1 }
 0x1a1   : > { %v1217_v36 = vadd.f32 %v1205_v35, %v652_v28  ;;  %v4321_v37 = vpop.f32.mrb[13].mxu1 }
 0x1ac   : > { %v1401_v38 = vpop.f32.mrb[14].mxu1 }
 0x1ad   : > { %v1413_v39 = vadd.f32 %v1401_v38, %v1015_v33  ;;  %v4332_v0 = vpop.f32.mrb[15].mxu1 }
 0x1b8   : > { %v1601_v40 = vpop.f32.mrb[16].mxu1 }
 0x1b9   : > { %v1613_v41 = vadd.f32 %v1601_v40, %v1217_v36  ;;  %v4343_v42 = vpop.f32.mrb[17].mxu1 }
 0x1c4   : > { %v1797_v43 = vpop.f32.mrb[18].mxu1 }
 0x1c5   : > { %v1809_v44 = vadd.f32 %v1797_v43, %v1413_v39  ;;  %v4354_v45 = vpop.f32.mrb[19].mxu1 }
 0x1d0   : > { %v1997_v46 = vpop.f32.mrb[20].mxu1 }
 0x1d1   : > { %v2009_v47 = vadd.f32 %v1997_v46, %v1613_v41  ;;  %v4365_v48 = vpop.f32.mrb[21].mxu1 }
 0x1dc   : > { %v2193_v49 = vpop.f32.mrb[22].mxu1 }
 0x1dd   : > { %v2205_v50 = vadd.f32 %v2193_v49, %v1809_v44  ;;  %v4376_v51 = vpop.f32.mrb[23].mxu1 }
 0x1e8   : > { %v2393_v52 = vpop.f32.mrb[24].mxu1 }
 0x1e9   : > { %v2405_v53 = vadd.f32 %v2393_v52, %v2009_v47  ;;  %v4387_v54 = vpop.f32.mrb[25].mxu1 }
 0x1f4   : > { %v2589_v55 = vpop.f32.mrb[26].mxu1 }
 0x1f5   : > { %v2601_v56 = vadd.f32 %v2589_v55, %v2205_v50  ;;  %v4398_v57 = vpop.f32.mrb[27].mxu1 }
 0x200   : > { %v2789_v58 = vpop.f32.mrb[28].mxu1 }
 0x201   : > { %v2801_v59 = vadd.f32 %v2789_v58, %v2405_v53  ;;  %v4409_v60 = vpop.f32.mrb[29].mxu1 }
 0x202   : > { %v3833_v60 = vpop.permute.xlu1 %3832 }
 0x20c   : > { %v2985_v61 = vpop.f32.mrb[30].mxu1 }
 0x20d   : > { %v2997_v62 = vadd.f32 %v2985_v61, %v2601_v56  ;;  %v4420_v1 = vpop.f32.mrb[31].mxu1 }
 0x218   : > { %v3185_v2 = vpop.f32.mrb[32].mxu1 }
 0x219   : > { %v3197_v3 = vadd.f32 %v3185_v2, %v2801_v59  ;;  %v4431_v5 = vpop.f32.mrb[33].mxu1  ;;  %v3806_v59 = vpop.permute.xlu0 %3805 }
 0x224   : > { %v3381_v6 = vpop.f32.mrb[34].mxu1 }
 0x225   : > { %v3393_v7 = vadd.f32 %v3381_v6, %v2997_v62  ;;  %v4442_v8 = vpop.f32.mrb[35].mxu1 }
 0x230   : > { %v3581_v10 = vpop.f32.mrb[36].mxu1 }
 0x231   : > { %v5504_v11 = vadd.f32 %v3581_v10, %v3197_v3  ;;  %v4453_v12 = vpop.f32.mrb[37].mxu1 }
 0x232   : > { %v5506_v14 = vpop.f32.mrb[4].mxu0 }
 0x233   : > { %v5508_v15 = vpop.f32.mrb[5].mxu0  ;;  %v3816_v3 = vadd.f32 %v3806_v59, %v5504_v11  ;;  %v3814_v12 = vadd.f32 %v3806_v59, %v5506_v14 }
 0x234   : > { %v3767_v17 = vpop.f32.mrb[0].mxu1 }
 0x235   : > { %v4473_v18 = vadd.f32 %v3796_v16, %v3767_v17  ;;  %v4458_v19 = vpop.f32.mrb[1].mxu1  ;;  %v3815_v17 = vadd.f32 %v3806_v59, %v5508_v15 }
 0x236   : > { %v3684_v20 = vpop.f32.mrb[0].mxu0 }
 0x237   : > { %v4474_v21 = vadd.f32 %v4473_v18, %v3823_v13  ;;  %v4465_v22 = vadd.f32 %v3796_v16, %v3684_v20  ;;  %v3686_v23 = vpop.f32.mrb[1].mxu0 }
 0x238   : > { %v4467_v25 = vadd.f32 %v3796_v16, %v3686_v23  ;;  %v3772_v26 = vpop.f32.mrb[2].mxu1 }
 0x239   : > { %v4188_v27 = vmul.f32 -1.442695, %v4474_v21  ;;  %v4466_v28 = vadd.f32 %v4465_v22, %v3823_v13  ;;  %v4475_v29 = vadd.f32 %v3801_v24, %v3772_v26  ;;  %v4461_v30 = vpop.f32.mrb[3].mxu1 }
 0x23a   : > { %v4468_v32 = vadd.f32 %v4467_v25, %v3823_v13  ;;  %v3690_v33 = vpop.f32.mrb[2].mxu0 }
 0x23b   : > { %4702 = vpow2.f32 %v4188_v27  ;;  %v4186_v34 = vmul.f32 -1.442695, %v4466_v28  ;;  %v4476_v35 = vadd.f32 %v4475_v29, %v3828_v31  ;;  %v4469_v36 = vadd.f32 %v3801_v24, %v3690_v33  ;;  %v3692_v37 = vpop.f32.mrb[3].mxu0 }
 0x23c   : > { %v4187_v38 = vmul.f32 -1.442695, %v4468_v32  ;;  %v4471_v39 = vadd.f32 %v3801_v24, %v3692_v37  ;;  %v3777_v0 = vpop.f32.mrb[38].mxu1 }
 0x23d   : > { %4704 = vpow2.f32 %v4186_v34  ;;  %v4470_v40 = vadd.f32 %v4469_v36, %v3828_v31  ;;  %v3789_v41 = vadd.f32 %v3777_v0, %v3393_v7  ;;  %v4464_v42 = vpop.f32.mrb[39].mxu1  ;;  %v4191_v43 = vmul.f32 -1.442695, %v4476_v35 }
 0x23e   : > { %4706 = vpow2.f32 %v4187_v38  ;;  %v4472_v44 = vadd.f32 %v4471_v39, %v3828_v31  ;;  %v3696_v45 = vpop.f32.mrb[6].mxu0 }
 0x23f   : > { %v3698_v46 = vpop.f32.mrb[7].mxu0  ;;  %v4189_v47 = vmul.f32 -1.442695, %v4470_v40  ;;  %4708 = vpow2.f32 %v4191_v43  ;;  %v3843_v62 = vadd.f32 %v3833_v60, %v3789_v41  ;;  %v3841_v6 = vadd.f32 %v3833_v60, %v3696_v45 }
 0x240   : > { %v4190_v48 = vmul.f32 -1.442695, %v4472_v44  ;;  %v3842_v8 = vadd.f32 %v3833_v60, %v3698_v46 }
 0x241   : > { %4710 = vpow2.f32 %v4189_v47 }
 0x242   : > { %4712 = vpow2.f32 %v4190_v48 }
 0x245   : > { %v4703_v49 = vpop.eup %4702 }
 0x246   : > { %v3858_v50 = vadd.f32 1.0, %v4703_v49 }
 0x247   : > { %v4705_v51 = vpop.eup %4704 }
 0x248   : > { %v4707_v52 = vpop.eup %4706  ;;  %4714 = vrcp.f32 %v3858_v50  ;;  %v3856_v53 = vadd.f32 1.0, %v4705_v51 }
 0x249   : > { %v3857_v54 = vadd.f32 1.0, %v4707_v52  ;;  %v4709_v55 = vpop.eup %4708 }
 0x24a   : > { %4716 = vrcp.f32 %v3856_v53  ;;  %v3879_v58 = vadd.f32 1.0, %v4709_v55 }
 0x24b   : > { %4718 = vrcp.f32 %v3857_v54  ;;  %v4711_v56 = vpop.eup %4710 }
 0x24c   : > { %v4713_v57 = vpop.eup %4712  ;;  %v3877_v61 = vadd.f32 1.0, %v4711_v56  ;;  %4720 = vrcp.f32 %v3879_v58 }
 0x24d   : > { %v3878_v2 = vadd.f32 1.0, %v4713_v57 }
 0x24e   : > { %4722 = vrcp.f32 %v3877_v61 }
 0x24f   : > { %4724 = vrcp.f32 %v3878_v2 }
 0x252   : > { %v4715_v1 = vpop.eup %4714 }
 0x253   : > { %v3888_v5 = vmul.f32 %v4715_v1, %v3843_v62 }
 0x254   : > { %v4717_v7 = vpop.eup %4716 }
 0x255   : > { %v4719_v10 = vpop.eup %4718  ;;  %v3891_v13 = vadd.f32 %v3888_v5, %v3816_v3  ;;  %v3886_v16 = vmul.f32 %v4717_v7, %v3841_v6 }
 0x256   : > { %v3887_v18 = vmul.f32 %v4719_v10, %v3842_v8  ;;  %v4721_v11 = vpop.eup %4720 }
 0x257   : > { %4726 = vtanh.f32 %v3891_v13  ;;  %v3889_v19 = vadd.f32 %v3886_v16, %v3814_v12  ;;  %v3897_v23 = vsub.f32 1.0, %v4721_v11  ;;  %v3903_v26 = vmul.f32 %v4721_v11, %v5175_v63 }
 0x258   : > { %v3890_v20 = vadd.f32 %v3887_v18, %v3815_v17  ;;  %v4723_v21 = vpop.eup %4722 }
 0x259   : > { %4728 = vtanh.f32 %v3889_v19  ;;  %v4725_v22 = vpop.eup %4724  ;;  %v3895_v24 = vsub.f32 1.0, %v4723_v21  ;;  %v3901_v30 = vmul.f32 %v4723_v21, %v5212_v9 }
 0x25a   : > { %4730 = vtanh.f32 %v3890_v20  ;;  %v3896_v27 = vsub.f32 1.0, %v4725_v22  ;;  %v3902_v33 = vmul.f32 %v4725_v22, %v5188_v4 }
 0x261   : > { %v4727_v14 = vpop.eup %4726 }
 0x262   : > { %v3900_v25 = vmul.f32 %v4727_v14, %v3897_v23 }
 0x263   : > { %v4729_v15 = vpop.eup %4728 }
 0x264   : > { %v4731_v28 = vpop.eup %4730  ;;  %v3898_v29 = vmul.f32 %v4729_v15, %v3895_v24  ;;  %v3906_v31 = vadd.f32 %v3903_v26, %v3900_v25 }
 0x265   : > { %v3899_v32 = vmul.f32 %v4731_v28, %v3896_v27 }
 0x266   : > { %v3904_v34 = vadd.f32 %v3901_v30, %v3898_v29  ;;  %3910 = vst.msk [vmem:[%s259_s14 + $0x10] sm:$0xff] %vm3909_vm12, %v3906_v31 }
 0x267   : > { %v3905_v35 = vadd.f32 %v3902_v33, %v3899_v32 }
 0x268   : > { %3907 = vst [vmem:[%s259_s14] sm:$0xff] %v3904_v34 }
 0x269   : > { %3908 = vst [vmem:[%s259_s14 + $0x8] sm:$0xff] %v3905_v35 }
 0x26a   : > { %4745 = shalt.err (!%p4742_p3)
}
 0x26b   : > { %s4746_s29 = scalar_lea.hbm %s5521_s18, 384  ;;  %s4750_s11 = scalar_lea.hbm %s5569_s6, 768 }
 0x26c   : > { %p4747_p4 = scmp.ne.s32.totalorder %s5521_s18, %s4746_s29  ;;  %p4751_p9 = scmp.lt.u32.totalorder %s5521_s18, %s5569_s6 }
 0x26d   : > { %p4752_p10 = scmp.lt.u32.totalorder %s4750_s11, %s4746_s29  ;;  %p4754_p12 = scmp.lt.u32.totalorder %s4746_s29, %s5521_s18 }
 0x26e   : > { %p4748_p7 = pnand %p4747_p4, %p4881_p5 }
 0x26f   : > { %p4753_p11 = por %p4752_p10, %p4751_p9 }
 0x270   : > { %p4749_p8 = pneg %p4748_p7 }
 0x271   : > { %p4755_p13 = por %p4754_p12, %p4753_p11 }
 0x273   : > { %p4756_p0 = pnand %p4755_p13, %p4749_p8 }
 0x275   : > { %4759 = shalt.err (!%p4756_p0)
}
 0x276   : > { %4649 = dma.vmem_to_hbm [thread:$0]  (%p4881_p5), %s5523_s15, 384, %s5521_s18, %s3912_s25  }
 0x277 PF: > { %p4655_p1 = scmp.ge.s32.totalorder %s4794_s24, 2  ;;  %s3938_s14 = sand.u32 1, %s4782_s21  }
 0x278   : > { %s3939_s16 = scalar_lea.sflag [#allocation3], %s3938_s14 }
 0x279   : > { %p4652_p2 = pnand %p4655_p1, %p4885_p6 }
 0x27b   : > { %4777 = dma.done.wait (!%p4652_p2), %s3939_s16, 384  }
 0x27c   : > { %4779 = vsyncadd (!%p4652_p2), %s3939_s16, 4294966912  ;;  %p16_p3 = scmp.ge.s32.totalorder %s4868_s27, 4   ;;  %s5572_s21 = smov %s4786_s22 }
 0x27d   : > { %s5573_s22 = smov %s4790_s23  ;;  %s5574_s23 = smov %s4879_s30 }
 0x27e   : > { %s5575_s24 = smov %s4868_s27  ;;  %18 = sbr.rel (!%p16_p3) target bundleno = 3 (0x3), region = 98 }
 0x285   :  { %3944 = vsyncpa [#allocation3], 1 }
 0x286   :  { %3946 = vsyncpa [#allocation3 + $0x1], 1 }

</bundles_post_ra>
